<compile_context>
chip_gen: v6e
topology: v6e:2x2x1
jax: 0.10.0
libtpu: 0.0.40
codegen_flags: <defaults>
</compile_context>

<pallas_src>
import jax
import jax.numpy as jnp
from jax.experimental import pallas as pl
from jax.experimental.pallas import tpu as pltpu

HIDDEN = 768          # self.bert_hidden_size in the PyTorch module
N_CLASSES = 4
HEAD_NAMES = [
    "Transportation", "Downtown", "Easy_to_find", "Queue", "Hospitality",
    "Parking", "Timely", "Level", "Cost_effective", "Discount",
    "Decoration", "Noise", "Space", "Sanitary", "Portion",
    "Taste", "Appearance", "Recommend",
]
N_HEADS = len(HEAD_NAMES)       # 18
OUT = N_HEADS * N_CLASSES       # 72
OUT_PAD = 128                   # lane-dense padded output width
_SUBLANE = 8                    # sublane tile


def _round_up(x, m):
    return (x + m - 1) // m * m


def _vmem_capacity_bytes():
    """Physical VMEM of the current chip; conservative v7x fallback if the query fails."""
    try:
        return int(pltpu.get_tpu_info().vmem_capacity_bytes)
    except Exception:
        return 64 * 1024 * 1024


def choose_tiles(batch, seq):
    """Generation-aware tiles: as large a batch tile as the VMEM budget allows (fills the MXU M
    dim and amortizes per-step overhead), with the S reduction axis bounding the working set."""
    vmem_cap = _vmem_capacity_bytes()
    # Share of VMEM reserved for the double-buffered bf16 emb tile + per-chunk f32 temporaries;
    # the rest (weights incl. their pipeline buffers, acc, output, spill slack) fits in headroom.
    budget = int(vmem_cap * 0.4)

    s_pad = _round_up(seq, _SUBLANE)
    tile_s = min(s_pad, 128)                 # bound per-step S extent; ragged tail masked by lens
    s_pad = _round_up(s_pad, tile_s)

    # bytes per batch row per grid step: 2x bf16 emb (double-buffered) + 1x f32 masked temp
    per_row = tile_s * HIDDEN * (2 * 2 + 4)
    tile_b = max(_SUBLANE, min(256, (budget // per_row) // _SUBLANE * _SUBLANE))

    b_pad = _round_up(batch, _SUBLANE)
    tile_b = min(tile_b, b_pad)
    # Keep >= 2 batch grid steps when the batch allows it (megacore sharding of the parallel axis).
    if b_pad > _SUBLANE and b_pad <= tile_b:
        tile_b = _round_up(b_pad // 2, _SUBLANE)
    b_pad = _round_up(b_pad, tile_b)
    return tile_b, b_pad, tile_s, s_pad


def _classifier_kernel(emb_ref, lens_ref, w_pool_ref, b_pool_ref,
                       w_heads_ref, b_heads_ref, out_ref, acc_ref):
    # emb_ref : (TB, TS, H) bf16; lens_ref : (TB, 1) int32; acc_ref : (TB, H) f32 scratch.
    j = pl.program_id(1)

    @pl.when(j == 0)
    def _():
        acc_ref[...] = jnp.zeros_like(acc_ref)

    tb, ts, _ = emb_ref.shape
    lens = lens_ref[...]                                            # (TB, 1) int32

    # Mask rebuilt in-kernel from the per-row lengths (no (B,S,1) mask DMA stream).
    s_idx = jax.lax.broadcasted_iota(jnp.int32, (tb, ts), 1) + j * ts
    mask = (s_idx < lens).astype(jnp.float32)                       # (TB, TS)

    # Masked sum over this S chunk; f32 upcast only per-chunk, accumulated in f32 scratch.
    emb = emb_ref[...].astype(jnp.float32)                          # (TB, TS, H)
    acc_ref[...] += jnp.sum(emb * mask[:, :, None], axis=1)         # (TB, H)

    @pl.when(j == pl.num_programs(1) - 1)
    def _():
        # Masked mean (stand-in for BERT [CLS] hidden state); divide on the EUP.
        denom = jnp.maximum(lens.astype(jnp.float32), 1.0)          # (TB, 1)
        h = acc_ref[...] * pl.reciprocal(denom, approx=True)        # (TB, H) f32

        # BERT pooler: dense(H -> H) + tanh. bf16 x bf16 MXU matmul, f32 accumulate.
        pooled = jnp.tanh(
            jnp.dot(h.astype(jnp.bfloat16), w_pool_ref[...],
                    preferred_element_type=jnp.float32)
            + b_pool_ref[...])                                      # (TB, H) f32

        # 18 classification heads fused into a single (H, 128) padded matmul; lane-dense store.
        out_ref[...] = (
            jnp.dot(pooled.astype(jnp.bfloat16), w_heads_ref[...],
                    preferred_element_type=jnp.float32)
            + b_heads_ref[...])                                     # (TB, OUT_PAD)


def prepare_classifier_weights(w_pool, b_pool, w_heads, b_heads):
    """One-time weight prep (bf16 casts + 128-lane head padding), hoisted out of the per-call path."""
    w_pool_b = w_pool.astype(jnp.bfloat16)                                   # (H, H)
    b_pool_f = b_pool.astype(jnp.float32).reshape(1, HIDDEN)                 # (1, H)
    w_heads_p = jnp.zeros((HIDDEN, OUT_PAD), jnp.bfloat16).at[:, :OUT].set(
        w_heads.astype(jnp.bfloat16))                                        # (H, 128)
    b_heads_p = jnp.zeros((1, OUT_PAD), jnp.float32).at[:, :OUT].set(
        b_heads.astype(jnp.float32).reshape(1, OUT))                         # (1, 128)
    return w_pool_b, b_pool_f, w_heads_p, b_heads_p


def emotion_classifier_forward(embeddings, seq_lens, prepared, *, batch, tile_b, tile_s):
    """embeddings: (B_pad, S_pad, H) bf16 (already padded upstream via the id gather);
       seq_lens:   (B_pad, 1) int32 valid-token counts; `batch` = original batch for slicing."""
    w_pool_b, b_pool_f, w_heads_p, b_heads_p = prepared
    B_pad, S_pad, H = embeddings.shape
    assert B_pad % tile_b == 0 and S_pad % tile_s == 0
    nb, ns = B_pad // tile_b, S_pad // tile_s

    logits = pl.pallas_call(
        _classifier_kernel,
        out_shape=jax.ShapeDtypeStruct((B_pad, OUT_PAD), jnp.float32),
        grid=(nb, ns),
        in_specs=[
            pl.BlockSpec((tile_b, tile_s, H), lambda i, j: (i, j, 0)),   # embeddings (B x S tiled)
            pl.BlockSpec((tile_b, 1), lambda i, j: (i, 0)),              # per-row lengths
            pl.BlockSpec((H, H), lambda i, j: (0, 0)),                   # pooler weight (resident)
            pl.BlockSpec((1, H), lambda i, j: (0, 0)),                   # pooler bias   (resident)
            pl.BlockSpec((H, OUT_PAD), lambda i, j: (0, 0)),             # stacked head weights
            pl.BlockSpec((1, OUT_PAD), lambda i, j: (0, 0)),             # stacked head biases
        ],
        out_specs=pl.BlockSpec((tile_b, OUT_PAD), lambda i, j: (i, 0)),
        scratch_shapes=[pltpu.VMEM((tile_b, HIDDEN), jnp.float32)],      # masked-sum accumulator
        compiler_params=pltpu.CompilerParams(
            dimension_semantics=("parallel", "arbitrary"),
            vmem_limit_bytes=int(_vmem_capacity_bytes() * 0.75)),
    )(embeddings, seq_lens, w_pool_b, b_pool_f, w_heads_p, b_heads_p)

    logits = logits[:batch, :OUT]                                     # drop batch / lane padding
    return {
        name: logits[:, k * N_CLASSES:(k + 1) * N_CLASSES]
        for k, name in enumerate(HEAD_NAMES)
    }


def _reference_logits(emb_bf16, attention_mask, w_pool, b_pool, w_heads, b_heads):
    # Pure-JAX reference matching the kernel's bf16 casts (f32 math, exact divide).
    emb = emb_bf16.astype(jnp.float32)
    mask = attention_mask.astype(jnp.float32)
    summed = jnp.sum(emb * mask[:, :, None], axis=1)
    denom = jnp.maximum(jnp.sum(mask, axis=1, keepdims=True), 1.0)
    h = (summed / denom).astype(jnp.bfloat16).astype(jnp.float32)
    wp = w_pool.astype(jnp.bfloat16).astype(jnp.float32)
    pooled = jnp.tanh(jnp.dot(h, wp) + b_pool)
    pooled = pooled.astype(jnp.bfloat16).astype(jnp.float32)
    wh = w_heads.astype(jnp.bfloat16).astype(jnp.float32)
    return jnp.dot(pooled, wh) + b_heads


def init_params(key, vocab_size=100, type_vocab_size=2, max_pos=32):
    ks = jax.random.split(key, 8)
    scale = 0.02
    word_emb = scale * jax.random.normal(ks[0], (vocab_size, HIDDEN), jnp.float32)
    type_emb = scale * jax.random.normal(ks[1], (type_vocab_size, HIDDEN), jnp.float32)
    pos_emb = scale * jax.random.normal(ks[2], (max_pos, HIDDEN), jnp.float32)
    w_pool = scale * jax.random.normal(ks[3], (HIDDEN, HIDDEN), jnp.float32)
    b_pool = jnp.zeros((1, HIDDEN), jnp.float32)
    w_heads = scale * jax.random.normal(ks[4], (HIDDEN, N_HEADS * N_CLASSES), jnp.float32)
    b_heads = jnp.zeros((1, N_HEADS * N_CLASSES), jnp.float32)
    return dict(word_emb=word_emb, type_emb=type_emb, pos_emb=pos_emb,
                w_pool=w_pool, b_pool=b_pool, w_heads=w_heads, b_heads=b_heads)


def embed(params, input_ids, token_type_ids):
    # Plain-JAX glue: embedding gathers (BERT embedding layer, no LayerNorm). Emits bf16 directly
    # so there is no separate full-size astype pass before the kernel.
    S = input_ids.shape[1]
    emb = (params["word_emb"][input_ids]
           + params["type_emb"][token_type_ids]
           + params["pos_emb"][:S][None, :, :])
    return emb.astype(jnp.bfloat16)


if __name__ == "__main__":
    key = jax.random.PRNGKey(0)
    k_param, k_ids = jax.random.split(key)

    B, S = 2, 8
    params = init_params(k_param)
    prepared = prepare_classifier_weights(
        params["w_pool"], params["b_pool"], params["w_heads"], params["b_heads"])

    input_ids = jax.random.randint(k_ids, (B, S), 0, 100, dtype=jnp.int32)
    token_type_ids = jnp.zeros((B, S), jnp.int32)
    attention_mask = jnp.concatenate(
        [jnp.ones((B, 6), jnp.float32), jnp.zeros((B, 2), jnp.float32)], axis=1)

    tile_b, b_pad, tile_s, s_pad = choose_tiles(B, S)

    # Pad in the cheap int32 domain so the embedding gather emits the padded (b_pad, s_pad, H)
    # bf16 tensor directly -- no full-size jnp.pad / astype of the embeddings through HBM.
    # Padded rows/positions get length 0 / fall beyond the valid length, so the kernel masks them.
    ids_p = jnp.zeros((b_pad, s_pad), jnp.int32).at[:B, :S].set(input_ids)
    tok_p = jnp.zeros((b_pad, s_pad), jnp.int32).at[:B, :S].set(token_type_ids)
    lens = jnp.zeros((b_pad, 1), jnp.int32).at[:B, 0].set(
        jnp.sum(attention_mask, axis=1).astype(jnp.int32))

    embeddings = embed(params, ids_p, tok_p)        # (b_pad, s_pad, H) bf16

    out = emotion_classifier_forward(
        embeddings, lens, prepared, batch=B, tile_b=tile_b, tile_s=tile_s)
    out = jax.block_until_ready(out)

    assert set(out.keys()) == set(HEAD_NAMES)
    for name in HEAD_NAMES:
        assert out[name].shape == (B, N_CLASSES)

    # Numerical sanity check against a pure-JAX reference (bf16-matched weights).
    ref = _reference_logits(embeddings[:B, :S], attention_mask,
                            params["w_pool"], params["b_pool"],
                            params["w_heads"], params["b_heads"])
    got = jnp.concatenate([out[name] for name in HEAD_NAMES], axis=1)
    assert jnp.allclose(got, ref, atol=2e-2, rtol=2e-2), \
        f"max abs err {float(jnp.max(jnp.abs(got - ref)))}"

    print("KERNEL_OK")
</pallas_src>

<mosaic_0001>
module attributes {stable_mosaic.version = 11 : i64} {
  func.func @_classifier_kernel(%arg0: i32, %arg1: i32, %arg2: memref<8x8x768xbf16, #tpu.memory_space<vmem>>, %arg3: memref<8x1xi32, #tpu.memory_space<vmem>>, %arg4: memref<768x768xbf16, #tpu.memory_space<vmem>>, %arg5: memref<1x768xf32, #tpu.memory_space<vmem>>, %arg6: memref<768x128xbf16, #tpu.memory_space<vmem>>, %arg7: memref<1x128xf32, #tpu.memory_space<vmem>>, %arg8: memref<8x128xf32, #tpu.memory_space<vmem>>, %arg9: memref<8x768xf32, #tpu.memory_space<vmem>>) attributes {dimension_semantics = [#tpu.dimension_semantics<parallel>, #tpu.dimension_semantics<arbitrary>], iteration_bounds = array<i64: 1, 1>, scalar_prefetch = 0 : i64, scratch_operands = 1 : i64, tpu.core_type = #tpu.core_type<tc>, window_params = [{transform_indices = @transform_0, window_bounds = array<i64: 8, 8, 768>}, {transform_indices = @transform_1, window_bounds = array<i64: 8, 1>}, {pipeline_mode = #tpu.pipeline_mode<synchronous>, transform_indices = @transform_2, window_bounds = array<i64: 768, 768>}, {pipeline_mode = #tpu.pipeline_mode<synchronous>, transform_indices = @transform_3, window_bounds = array<i64: 1, 768>}, {pipeline_mode = #tpu.pipeline_mode<synchronous>, transform_indices = @transform_4, window_bounds = array<i64: 768, 128>}, {pipeline_mode = #tpu.pipeline_mode<synchronous>, transform_indices = @transform_5, window_bounds = array<i64: 1, 128>}, {transform_indices = @transform_6, window_bounds = array<i64: 8, 128>}]} {
    %c0_i32 = arith.constant 0 : i32
    %0 = arith.cmpi eq, %arg1, %c0_i32 : i32
    %1 = arith.extui %0 : i1 to i32
    %c0_i32_0 = arith.constant 0 : i32
    %2 = arith.cmpi ne, %1, %c0_i32_0 : i32
    scf.if %2 {
      %cst_11 = arith.constant 0.000000e+00 : f32
      %24 = vector.broadcast %cst_11 : f32 to vector<8x768xf32>
      %c0_12 = arith.constant 0 : index
      %c0_13 = arith.constant 0 : index
      %25 = vector.load %arg9[%c0_12, %c0_13] : memref<8x768xf32, #tpu.memory_space<vmem>>, vector<8x768xf32>
      tpu.vector_store %arg9[%c0_12, %c0_13], %24 {strides = array<i32>} : memref<8x768xf32, #tpu.memory_space<vmem>>, vector<8x768xf32>,
    } else {
    }
    %c0 = arith.constant 0 : index
    %c0_1 = arith.constant 0 : index
    %3 = vector.load %arg3[%c0, %c0_1] : memref<8x1xi32, #tpu.memory_space<vmem>>, vector<8x1xi32>
    %4 = tpu.iota {dimensions = array<i32: 1>} : vector<8x8xi32>
    %c8_i32 = arith.constant 8 : i32
    %5 = arith.muli %arg1, %c8_i32 : i32
    %6 = vector.broadcast %5 : i32 to vector<8x8xi32>
    %7 = arith.addi %4, %6 : vector<8x8xi32>
    %8 = vector.broadcast %3 : vector<8x1xi32> to vector<8x8xi32>
    %9 = arith.cmpi slt, %7, %8 : vector<8x8xi32>
    %10 = arith.extui %9 : vector<8x8xi1> to vector<8x8xi32>
    %11 = arith.sitofp %10 : vector<8x8xi32> to vector<8x8xf32>
    %c0_2 = arith.constant 0 : index
    %c0_3 = arith.constant 0 : index
    %c0_4 = arith.constant 0 : index
    %12 = vector.load %arg2[%c0_2, %c0_3, %c0_4] : memref<8x8x768xbf16, #tpu.memory_space<vmem>>, vector<8x8x768xbf16>
    %13 = arith.extf %12 : vector<8x8x768xbf16> to vector<8x8x768xf32>
    %c0_5 = arith.constant 0 : index
    %c0_6 = arith.constant 0 : index
    %14 = vector.load %arg9[%c0_5, %c0_6] : memref<8x768xf32, #tpu.memory_space<vmem>>, vector<8x768xf32>
    %15 = vector.shape_cast %11 : vector<8x8xf32> to vector<8x8x1xf32>
    %16 = vector.broadcast %15 : vector<8x8x1xf32> to vector<8x8x768xf32>
    %17 = arith.mulf %13, %16 : vector<8x8x768xf32>
    %cst = arith.constant dense<0.000000e+00> : vector<8x768xf32>
    %18 = vector.multi_reduction <add>, %17, %cst [1] : vector<8x8x768xf32> to vector<8x768xf32>
    %19 = arith.addf %14, %18 : vector<8x768xf32>
    %c0_7 = arith.constant 0 : index
    %c0_8 = arith.constant 0 : index
    %20 = vector.load %arg9[%c0_7, %c0_8] : memref<8x768xf32, #tpu.memory_space<vmem>>, vector<8x768xf32>
    tpu.vector_store %arg9[%c0_7, %c0_8], %19 {strides = array<i32>} : memref<8x768xf32, #tpu.memory_space<vmem>>, vector<8x768xf32>,
    %c0_i32_9 = arith.constant 0 : i32
    %21 = arith.cmpi eq, %arg1, %c0_i32_9 : i32
    %22 = arith.extui %21 : i1 to i32
    %c0_i32_10 = arith.constant 0 : i32
    %23 = arith.cmpi ne, %22, %c0_i32_10 : i32
    scf.if %23 {
      %24 = arith.sitofp %3 : vector<8x1xi32> to vector<8x1xf32>
      %cst_11 = arith.constant 1.000000e+00 : f32
      %25 = vector.broadcast %cst_11 : f32 to vector<8x1xf32>
      %26 = arith.maximumf %24, %25 : vector<8x1xf32>
      %c0_12 = arith.constant 0 : index
      %c0_13 = arith.constant 0 : index
      %27 = vector.load %arg9[%c0_12, %c0_13] : memref<8x768xf32, #tpu.memory_space<vmem>>, vector<8x768xf32>
      %28 = tpu.reciprocal %26 {approx = true} : vector<8x1xf32> -> vector<8x1xf32>
      %29 = vector.broadcast %28 : vector<8x1xf32> to vector<8x768xf32>
      %30 = arith.mulf %27, %29 : vector<8x768xf32>
      %31 = arith.truncf %30 : vector<8x768xf32> to vector<8x768xbf16>
      %c0_14 = arith.constant 0 : index
      %c0_15 = arith.constant 0 : index
      %32 = vector.load %arg4[%c0_14, %c0_15] : memref<768x768xbf16, #tpu.memory_space<vmem>>, vector<768x768xbf16>
      %cst_16 = arith.constant dense<0.000000e+00> : vector<8x768xf32>
      %33 = tpu.matmul %31, %32, %cst_16 {dimension_numbers = #tpu.dot_dimension_numbers<[1], [0], [0], [1], [0, 0, 1, 1], [], []>} : vector<8x768xbf16>, vector<768x768xbf16>, vector<8x768xf32> -> vector<8x768xf32>
      %c0_17 = arith.constant 0 : index
      %c0_18 = arith.constant 0 : index
      %34 = vector.load %arg5[%c0_17, %c0_18] : memref<1x768xf32, #tpu.memory_space<vmem>>, vector<1x768xf32>
      %35 = vector.broadcast %34 : vector<1x768xf32> to vector<8x768xf32>
      %36 = arith.addf %33, %35 : vector<8x768xf32>
      %37 = math.tanh %36 : vector<8x768xf32>
      %38 = arith.truncf %37 : vector<8x768xf32> to vector<8x768xbf16>
      %c0_19 = arith.constant 0 : index
      %c0_20 = arith.constant 0 : index
      %39 = vector.load %arg6[%c0_19, %c0_20] : memref<768x128xbf16, #tpu.memory_space<vmem>>, vector<768x128xbf16>
      %cst_21 = arith.constant dense<0.000000e+00> : vector<8x128xf32>
      %40 = tpu.matmul %38, %39, %cst_21 {dimension_numbers = #tpu.dot_dimension_numbers<[1], [0], [0], [1], [0, 0, 1, 1], [], []>} : vector<8x768xbf16>, vector<768x128xbf16>, vector<8x128xf32> -> vector<8x128xf32>
      %c0_22 = arith.constant 0 : index
      %c0_23 = arith.constant 0 : index
      %41 = vector.load %arg7[%c0_22, %c0_23] : memref<1x128xf32, #tpu.memory_space<vmem>>, vector<1x128xf32>
      %42 = vector.broadcast %41 : vector<1x128xf32> to vector<8x128xf32>
      %43 = arith.addf %40, %42 : vector<8x128xf32>
      %c0_24 = arith.constant 0 : index
      %c0_25 = arith.constant 0 : index
      %44 = vector.load %arg8[%c0_24, %c0_25] : memref<8x128xf32, #tpu.memory_space<vmem>>, vector<8x128xf32>
      tpu.vector_store %arg8[%c0_24, %c0_25], %43 {strides = array<i32>} : memref<8x128xf32, #tpu.memory_space<vmem>>, vector<8x128xf32>,
    } else {
    }
    return
  }
  func.func @transform_0(%arg0: i32, %arg1: i32) -> (i32, i32, i32) {
    %c0_i32 = arith.constant 0 : i32
    %c0_i32_0 = arith.constant 0 : i32
    return %arg0, %arg1, %c0_i32 : i32, i32, i32
  }
  func.func @transform_1(%arg0: i32, %arg1: i32) -> (i32, i32) {
    %c0_i32 = arith.constant 0 : i32
    %c0_i32_0 = arith.constant 0 : i32
    return %arg0, %c0_i32 : i32, i32
  }
  func.func @transform_2(%arg0: i32, %arg1: i32) -> (i32, i32) {
    %c0_i32 = arith.constant 0 : i32
    %c0_i32_0 = arith.constant 0 : i32
    %c0_i32_1 = arith.constant 0 : i32
    return %c0_i32, %c0_i32_0 : i32, i32
  }
  func.func @transform_3(%arg0: i32, %arg1: i32) -> (i32, i32) {
    %c0_i32 = arith.constant 0 : i32
    %c0_i32_0 = arith.constant 0 : i32
    %c0_i32_1 = arith.constant 0 : i32
    return %c0_i32, %c0_i32_0 : i32, i32
  }
  func.func @transform_4(%arg0: i32, %arg1: i32) -> (i32, i32) {
    %c0_i32 = arith.constant 0 : i32
    %c0_i32_0 = arith.constant 0 : i32
    %c0_i32_1 = arith.constant 0 : i32
    return %c0_i32, %c0_i32_0 : i32, i32
  }
  func.func @transform_5(%arg0: i32, %arg1: i32) -> (i32, i32) {
    %c0_i32 = arith.constant 0 : i32
    %c0_i32_0 = arith.constant 0 : i32
    %c0_i32_1 = arith.constant 0 : i32
    return %c0_i32, %c0_i32_0 : i32, i32
  }
  func.func @transform_6(%arg0: i32, %arg1: i32) -> (i32, i32) {
    %c0_i32 = arith.constant 0 : i32
    %c0_i32_0 = arith.constant 0 : i32
    return %arg0, %c0_i32 : i32, i32
  }
}

</mosaic_0001>

<bundles_post_ra>
// kernel: tpu_custom_call.1
= control target key start
LH: loop header
LB: loop body
LE: loop exit
PB: predicated region body
PF: predicated region fallthrough
CT: control target
= control target key end

     0   :  { %11 = vsyncpa [#allocation4], 0  ;;  %s4998_s0 = inlined_call_operand.hbm [shape: bf16[8,8,768], index: 0, kind: input, shape index: {}]   ;;  %s4999_s1 = inlined_call_operand.vmem [shape: s32[8,1], index: 1, kind: input, shape index: {}]   ;;  %s5000_s2 = inlined_call_operand.hbm [shape: bf16[768,768], index: 2, kind: input, shape index: {}]   ;;  %s5001_s3 = inlined_call_operand.hbm [shape: f32[1,768], index: 3, kind: input, shape index: {}]   ;;  %s5002_s4 = inlined_call_operand.hbm [shape: bf16[768,128], index: 4, kind: input, shape index: {}]   ;;  %s5003_s5 = inlined_call_operand.hbm [shape: f32[1,128], index: 5, kind: input, shape index: {}]   ;;  %s5004_s6 = inlined_call_operand.hbm [shape: f32[8,128], index: 6, kind: output, shape index: {}]  }
   0x1   :  { %12 = vsyncpa [#allocation7], 0 }
   0x2   :  { %13 = vsyncpa [#allocation10], 0 }
   0x3   :  { %14 = vsyncpa [#allocation5], 0  ;;  %s4435_s21 = smov [#allocation6]   ;;  %s4436_s23 = smov [#allocation9]  }
   0x4   :  { %s34_s22 = sshll.u32 %s4435_s21, 4  ;;  %s56_s24 = sshll.u32 %s4436_s23, 4  ;;  %s35_s22 = int_to_ptr.vmem [resolvable:$true] %s34_s22  ;;  %s57_s24 = int_to_ptr.vmem [resolvable:$true] %s56_s24 }
   0x5   :  { %s4315_s25 = scalar_lea.vmem %s35_s22, 36864  ;;  %p4320_p1 = scmp.lt.s32.totalorder %s35_s22, %s35_s22 }
   0x6   :  { %p4316_p0 = scmp.ne.s32.totalorder %s35_s22, %s4315_s25  ;;  %p4321_p2 = scmp.lt.s32.totalorder %s4315_s25, %s4315_s25 }
   0x8   :  { %p4322_p3 = por %p4321_p2, %p4320_p1 }
   0xa   :  { %p4323_p4 = pnand %p4322_p3, %p4316_p0 }
   0xc   :  { %4326 = shalt.err (!%p4323_p4)
}
   0xd   :  { %s4437_s26 = smov 384   ;;  %s4438_s27 = smov 24  }
   0xe   :  { %40 = dma.hbm_to_vmem [thread:$0]  %s5000_s2, 36864, %s35_s22, [#allocation7], %s4437_s26, %s4437_s26, %s4438_s27  }
   0xf   :  { %s4335_s30 = scalar_lea.vmem %s57_s24, 6144  ;;  %p4340_p6 = scmp.lt.s32.totalorder %s57_s24, %s57_s24 }
  0x10   :  { %p4336_p5 = scmp.ne.s32.totalorder %s57_s24, %s4335_s30  ;;  %p4341_p7 = scmp.lt.s32.totalorder %s4335_s30, %s4335_s30 }
  0x12   :  { %p4342_p8 = por %p4341_p7, %p4340_p6 }
  0x14   :  { %p4343_p9 = pnand %p4342_p8, %p4336_p5 }
  0x16   :  { %4346 = shalt.err (!%p4343_p9)
}
  0x17   :  { %s4439_s7 = smov 64   ;;  %s4440_s8 = smov 4  }
  0x18   :  { %62 = dma.hbm_to_vmem [thread:$0]  %s5002_s4, 6144, %s57_s24, [#allocation10], %s4439_s7, %s4439_s7, %s4440_s8  }
  0x19   :  { %s4441_s11 = smov [#allocation3]   ;;  %s4442_s13 = smov [#allocation8]  }
  0x1a   :  { %s20_s12 = sshll.u32 %s4441_s11, 4  ;;  %s47_s14 = sshll.u32 %s4442_s13, 4  ;;  %s21_s12 = int_to_ptr.vmem [resolvable:$true] %s20_s12  ;;  %s48_s14 = int_to_ptr.vmem [resolvable:$true] %s47_s14 }
  0x1b   :  { %s4355_s2 = scalar_lea.vmem %s21_s12, 3072  ;;  %p4360_p11 = scmp.lt.s32.totalorder %s21_s12, %s21_s12 }
  0x1c   :  { %p4356_p10 = scmp.ne.s32.totalorder %s21_s12, %s4355_s2  ;;  %p4361_p12 = scmp.lt.s32.totalorder %s4355_s2, %s4355_s2 }
  0x1e   :  { %p4362_p13 = por %p4361_p12, %p4360_p11 }
  0x20   :  { %p4363_p0 = pnand %p4362_p13, %p4356_p10 }
  0x22   :  { %4366 = shalt.err (!%p4363_p0)
}
  0x23   :  { %26 = dma.hbm_to_vmem [thread:$0]  %s4998_s0, 3072, %s21_s12, [#allocation4], %s4437_s26, %s4437_s26, %s4438_s27  }
  0x24   :  { %s4375_s17 = scalar_lea.vmem %s48_s14, 96  ;;  %p4380_p2 = scmp.lt.s32.totalorder %s48_s14, %s48_s14 }
  0x25   :  { %p4376_p1 = scmp.ne.s32.totalorder %s48_s14, %s4375_s17  ;;  %p4381_p3 = scmp.lt.s32.totalorder %s4375_s17, %s4375_s17 }
  0x27   :  { %p4382_p4 = por %p4381_p3, %p4380_p2 }
  0x29   :  { %p4383_p5 = pnand %p4382_p4, %p4376_p1 }
  0x2b   :  { %4386 = shalt.err (!%p4383_p5)
}
  0x2c   :  { %50 = dma.hbm_to_vmem [thread:$0]  %s5001_s3, 96, %s48_s14, [#allocation7]  }
  0x2d   :  { %s4443_s19 = smov [#allocation11]  }
  0x2e   :  { %s69_s20 = sshll.u32 %s4443_s19, 4  ;;  %s70_s20 = int_to_ptr.vmem [resolvable:$true] %s69_s20 }
  0x2f   :  { %s4395_s21 = scalar_lea.vmem %s70_s20, 16  ;;  %s4399_s22 = scalar_lea.vmem %s70_s20, 32 }
  0x30   :  { %p4396_p6 = scmp.ne.s32.totalorder %s70_s20, %s4395_s21  ;;  %p4400_p7 = scmp.lt.s32.totalorder %s70_s20, %s70_s20 }
  0x31   :  { %p4401_p8 = scmp.lt.s32.totalorder %s4399_s22, %s4395_s21 }
  0x33   :  { %p4402_p9 = por %p4401_p8, %p4400_p7 }
  0x35   :  { %p4403_p10 = pnand %p4402_p9, %p4396_p6 }
  0x37   :  { %4406 = shalt.err (!%p4403_p10)
}
  0x38   :  { %72 = dma.hbm_to_vmem [thread:$0]  %s5003_s5, 16, %s70_s20, [#allocation10]  }
  0x39   :  { %4427 = dma.done.wait [#allocation4], 3072  }
  0x3a   :  { %4428 = vsyncadd [#allocation4], 4294964224 }
  0x3b   :  { %4429 = dma.done.wait [#allocation7], 36960  }
  0x3c   :  { %4430 = vsyncadd [#allocation7], 4294930336 }
  0x3d   :  { %4431 = dma.done.wait [#allocation10], 6160  }
  0x3e   :  { %4432 = vsyncadd [#allocation10], 4294961136  ;;  %v4444_v0 = vmov 0   ;;  %v4500_v1 = vld [vmem:[%s4999_s1] sm:$0xff]  ;;  %v3813_v2 = vld [vmem:[#allocation6 + $0x154] ss:$24 sps:$4 sm:$0xff]   ;;  %v100_v34 = vlaneseq }
  0x3f   :  { %3811 = vset.pattern.permute.xlu0 %v4444_v0  ;;  %3812 = vset.pattern.permute.xlu1 %v4444_v0  ;;  %v3815_v3 = vld [vmem:[#allocation6 + $0x454] ss:$24 sps:$4 sm:$0xff]   ;;  %v3817_v4 = vld [vmem:[#allocation6 + $0x150] ss:$24 sps:$4 sm:$0xff]   ;;  %v3819_v6 = vld [vmem:[#allocation6 + $0x124] ss:$24 sps:$4 sm:$0xff]   ;;  %v699_v36 = vcvt.s32.f32 %v4500_v1 }
  0x40   :  { %106 = vperm.xlu0 %3811, %v4500_v1   ;;  %v3818_v5 = vld [vmem:[#allocation6 + $0x450] ss:$24 sps:$4 sm:$0xff]   ;;  %v3821_v7 = vld [vmem:[#allocation6 + $0x424] ss:$24 sps:$4 sm:$0xff]   ;;  %2485 = vmatprep.subr.bf16.mxu0 %v3813_v2  ;;  %v3823_v8 = vld [vmem:[#allocation6 + $0x120] ss:$24 sps:$4 sm:$0xff]  }
  0x41   :  { %2526 = vmatprep.subr.bf16.mxu1 %v3815_v3  ;;  %2486 = vmatpush1.bf16.msra.mxu0 %v3817_v4  ;;  %v3824_v9 = vld [vmem:[#allocation6 + $0x420] ss:$24 sps:$4 sm:$0xff]   ;;  %v3825_v10 = vld [vmem:[#allocation6 + $0xf4] ss:$24 sps:$4 sm:$0xff]   ;;  %v3829_v12 = vld [vmem:[#allocation6 + $0xf0] ss:$24 sps:$4 sm:$0xff]  }
  0x42   :  { %2527 = vmatpush1.bf16.msra.mxu1 %v3818_v5  ;;  %2487 = vmatprep.subr.bf16.mxu0 %v3819_v6  ;;  %v3827_v11 = vld [vmem:[#allocation6 + $0x3f4] ss:$24 sps:$4 sm:$0xff]   ;;  %v3830_v13 = vld [vmem:[#allocation6 + $0x3f0] ss:$24 sps:$4 sm:$0xff]   ;;  %v3831_v14 = vld [vmem:[#allocation6 + $0xc4] ss:$24 sps:$4 sm:$0xff]  }
  0x43   :  { %2528 = vmatprep.subr.bf16.mxu1 %v3821_v7  ;;  %v3833_v15 = vld [vmem:[#allocation6 + $0x3c4] ss:$24 sps:$4 sm:$0xff]   ;;  %v3835_v16 = vld [vmem:[#allocation6 + $0xc0] ss:$24 sps:$4 sm:$0xff]   ;;  %v3837_v18 = vld [vmem:[#allocation6 + $0x94] ss:$24 sps:$4 sm:$0xff]  }
  0x44   :  { %v3836_v17 = vld [vmem:[#allocation6 + $0x3c0] ss:$24 sps:$4 sm:$0xff]   ;;  %v3839_v19 = vld [vmem:[#allocation6 + $0x394] ss:$24 sps:$4 sm:$0xff]   ;;  %v3841_v20 = vld [vmem:[#allocation6 + $0x90] ss:$24 sps:$4 sm:$0xff]  }
  0x45   :  { %2488 = vmatpush1.bf16.msra.mxu0 %v3823_v8  ;;  %v3842_v21 = vld [vmem:[#allocation6 + $0x390] ss:$24 sps:$4 sm:$0xff]   ;;  %v3843_v22 = vld [vmem:[#allocation6 + $0x64] ss:$24 sps:$4 sm:$0xff]   ;;  %v3847_v24 = vld [vmem:[#allocation6 + $0x60] ss:$24 sps:$4 sm:$0xff]  }
  0x46   :  { %2529 = vmatpush1.bf16.msra.mxu1 %v3824_v9  ;;  %2489 = vmatprep.subr.bf16.mxu0 %v3825_v10  ;;  %v3845_v23 = vld [vmem:[#allocation6 + $0x364] ss:$24 sps:$4 sm:$0xff]   ;;  %v3848_v25 = vld [vmem:[#allocation6 + $0x360] ss:$24 sps:$4 sm:$0xff]   ;;  %v3849_v26 = vld [vmem:[#allocation6 + $0x34] ss:$24 sps:$4 sm:$0xff]  }
  0x47   :  { %2530 = vmatprep.subr.bf16.mxu1 %v3827_v11  ;;  %v3851_v27 = vld [vmem:[#allocation6 + $0x334] ss:$24 sps:$4 sm:$0xff]   ;;  %v3853_v28 = vld [vmem:[#allocation6 + $0x30] ss:$24 sps:$4 sm:$0xff]   ;;  %v3855_v30 = vld [vmem:[#allocation6 + $0x4] ss:$24 sps:$4 sm:$0xff]  }
  0x48   :  { %v3854_v29 = vld [vmem:[#allocation6 + $0x330] ss:$24 sps:$4 sm:$0xff]   ;;  %v3857_v31 = vld [vmem:[#allocation6 + $0x304] ss:$24 sps:$4 sm:$0xff]   ;;  %v3859_v32 = vld [vmem:[#allocation6] ss:$24 sps:$4 sm:$0xff]  }
  0x49   :  { %2490 = vmatpush1.bf16.msra.mxu0 %v3829_v12  ;;  %v3860_v33 = vld [vmem:[#allocation6 + $0x300] ss:$24 sps:$4 sm:$0xff]   ;;  %v4503_v35 = vshrl.u32 %v100_v34, 7  ;;  %v101_v37 = vand.u32 127, %v100_v34  ;;  %v700_v39 = vmax.f32 %v699_v36, 1.0  ;;  %v4445_v44 = vmov 0.0  }
  0x4a   :  { %2531 = vmatpush1.bf16.msra.mxu1 %v3830_v13  ;;  %2491 = vmatprep.subr.bf16.mxu0 %v3831_v14  ;;  %v3861_v47 = vld [vmem:[#allocation6 + $0x2d4] ss:$24 sps:$4 sm:$0xff]   ;;  %v3865_v51 = vld [vmem:[#allocation6 + $0x2d0] ss:$24 sps:$4 sm:$0xff]   ;;  %v3867_v63 = vld [vmem:[#allocation6 + $0x2a4] ss:$24 sps:$4 sm:$0xff]  }
  0x4b   :  { %2532 = vmatprep.subr.bf16.mxu1 %v3833_v15  ;;  %5017 = vst [vmem:[#allocation17_spill] sm:$0xff] %v4503_v35  ;;  %v5009_v38 = vsub.s32 1, %v4503_v35  ;;  %v5010_v40 = vsub.s32 0, %v4503_v35  ;;  %v5008_v41 = vsub.s32 2, %v4503_v35  ;;  %v5007_v42 = vsub.s32 3, %v4503_v35  ;;  %s4446_s1 = smov [#allocation12]  }
  0x4c   :  { %v5006_v46 = vsub.s32 4, %v4503_v35  ;;  %v3863_v48 = vld [vmem:[#allocation6 + $0x5d4] ss:$24 sps:$4 sm:$0xff]   ;;  %v3866_v52 = vld [vmem:[#allocation6 + $0x5d0] ss:$24 sps:$4 sm:$0xff]   ;;  %4293 = vrcp.f32 %v700_v39  ;;  %v5005_v53 = vsub.s32 5, %v4503_v35 }
  0x4d   :  { %2492 = vmatpush1.bf16.msra.mxu0 %v3835_v16  ;;  %v233_v54 = vsub.s32 6, %v4503_v35  ;;  %v240_v55 = vsub.s32 7, %v4503_v35  ;;  %v3869_v0 = vld [vmem:[#allocation6 + $0x5a4] ss:$24 sps:$4 sm:$0xff]   ;;  %v3871_v1 = vld [vmem:[#allocation6 + $0x2a0] ss:$24 sps:$4 sm:$0xff]  }
  0x4e   :  { %2533 = vmatpush1.bf16.msra.mxu1 %v3836_v17  ;;  %2493 = vmatprep.subr.bf16.mxu0 %v3837_v18  ;;  %v3872_v2 = vld [vmem:[#allocation6 + $0x5a0] ss:$24 sps:$4 sm:$0xff]   ;;  %v3873_v3 = vld [vmem:[#allocation6 + $0x274] ss:$24 sps:$4 sm:$0xff]   ;;  %v3877_v5 = vld [vmem:[#allocation6 + $0x270] ss:$24 sps:$4 sm:$0xff]  }
  0x4f   :  { %2534 = vmatprep.subr.bf16.mxu1 %v3839_v19  ;;  %v3875_v4 = vld [vmem:[#allocation6 + $0x574] ss:$24 sps:$4 sm:$0xff]   ;;  %v3878_v6 = vld [vmem:[#allocation6 + $0x570] ss:$24 sps:$4 sm:$0xff]   ;;  %v3879_v7 = vld [vmem:[#allocation6 + $0x244] ss:$24 sps:$4 sm:$0xff]  }
  0x50   :  { %v3881_v8 = vld [vmem:[#allocation6 + $0x544] ss:$24 sps:$4 sm:$0xff]   ;;  %v3883_v9 = vld [vmem:[#allocation6 + $0x240] ss:$24 sps:$4 sm:$0xff]   ;;  %v3885_v11 = vld [vmem:[#allocation6 + $0x214] ss:$24 sps:$4 sm:$0xff]  }
  0x51   :  { %2494 = vmatpush1.bf16.msra.mxu0 %v3841_v20  ;;  %v3884_v10 = vld [vmem:[#allocation6 + $0x540] ss:$24 sps:$4 sm:$0xff]   ;;  %v3887_v12 = vld [vmem:[#allocation6 + $0x514] ss:$24 sps:$4 sm:$0xff]   ;;  %v3889_v13 = vld [vmem:[#allocation6 + $0x210] ss:$24 sps:$4 sm:$0xff]  }
  0x52   :  { %2535 = vmatpush1.bf16.msra.mxu1 %v3842_v21  ;;  %2495 = vmatprep.subr.bf16.mxu0 %v3843_v22  ;;  %v3890_v14 = vld [vmem:[#allocation6 + $0x510] ss:$24 sps:$4 sm:$0xff]   ;;  %v3891_v15 = vld [vmem:[#allocation6 + $0x1e4] ss:$24 sps:$4 sm:$0xff]   ;;  %v3895_v17 = vld [vmem:[#allocation6 + $0x1e0] ss:$24 sps:$4 sm:$0xff]  }
  0x53   :  { %2536 = vmatprep.subr.bf16.mxu1 %v3845_v23  ;;  %v3893_v16 = vld [vmem:[#allocation6 + $0x4e4] ss:$24 sps:$4 sm:$0xff]   ;;  %v3896_v18 = vld [vmem:[#allocation6 + $0x4e0] ss:$24 sps:$4 sm:$0xff]   ;;  %v3897_v19 = vld [vmem:[#allocation6 + $0x1b4] ss:$24 sps:$4 sm:$0xff]  }
  0x54   :  { %v3899_v20 = vld [vmem:[#allocation6 + $0x4b4] ss:$24 sps:$4 sm:$0xff]   ;;  %v3901_v21 = vld [vmem:[#allocation6 + $0x1b0] ss:$24 sps:$4 sm:$0xff]   ;;  %v3903_v23 = vld [vmem:[#allocation6 + $0x184] ss:$24 sps:$4 sm:$0xff]  }
  0x55   :  { %2496 = vmatpush1.bf16.msra.mxu0 %v3847_v24  ;;  %v3902_v22 = vld [vmem:[#allocation6 + $0x4b0] ss:$24 sps:$4 sm:$0xff]   ;;  %v3905_v24 = vld [vmem:[#allocation6 + $0x484] ss:$24 sps:$4 sm:$0xff]   ;;  %vm629_vm1 = vcmask 1041409   ;;  %vm631_vm2 = vcmask 1042434  }
  0x56   :  { %2537 = vmatpush1.bf16.msra.mxu1 %v3848_v25  ;;  %2497 = vmatprep.subr.bf16.mxu0 %v3849_v26  ;;  %v3907_v25 = vld [vmem:[#allocation6 + $0x180] ss:$24 sps:$4 sm:$0xff]   ;;  %v4540_v39 = vld [vmem:[#allocation3 + $0x30] sm:$0xff]  ;;  %vm633_vm3 = vcmask 1043459   ;;  %vm635_vm4 = vcmask 1044484   ;;  %vm637_vm5 = vcmask 1045509  }
  0x57   :  { %2538 = vmatprep.subr.bf16.mxu1 %v3851_v27  ;;  %v3908_v26 = vld [vmem:[#allocation6 + $0x480] ss:$24 sps:$4 sm:$0xff]   ;;  %v3911_v27 = vld [vmem:[#allocation6 + $0x754] ss:$24 sps:$4 sm:$0xff]   ;;  %vm639_vm6 = vcmask 1046534   ;;  %vm641_vm7 = vcmask 1047559  }
  0x58   :  { %s3384_s5 = sshll.u32 %s4446_s1, 4  ;;  %s3385_s5 = int_to_ptr.vmem [resolvable:$true] %s3384_s5 }
  0x59   :  { %2498 = vmatpush1.bf16.msra.mxu0 %v3853_v28  ;;  %v4294_v62 = vpop.eup %4293  ;;  %v3914_v28 = vld [vmem:[#allocation6 + $0x15c] ss:$24 sps:$4 sm:$0xff]   ;;  %s4407_s25 = scalar_lea.vmem %s3385_s5, 128  ;;  %p4412_p12 = scmp.lt.s32.totalorder %s3385_s5, %s3385_s5 }
  0x5a   :  { %2539 = vmatpush1.bf16.msra.mxu1 %v3854_v29  ;;  %2499 = vmatprep.subr.bf16.mxu0 %v3855_v30  ;;  %v4526_v29 = vld [vmem:[#allocation3 + $0x18] sm:$0xff]  ;;  %v4528_v30 = vld [vmem:[#allocation3 + $0x20] sm:$0xff]  ;;  %p4408_p11 = scmp.ne.s32.totalorder %s3385_s5, %s4407_s25  ;;  %p4413_p13 = scmp.lt.s32.totalorder %s4407_s25, %s4407_s25 }
  0x5b   :  { %2540 = vmatprep.subr.bf16.mxu1 %v3857_v31  ;;  %v4530_v31 = vld [vmem:[#allocation3 + $0x28] sm:$0xff]  ;;  %v141_v34 = vunpack.c.l.bf16 %v4526_v29  ;;  %v142_v36 = vunpack.c.h.bf16 %v4526_v29 }
  0x5c   :  { %p4414_p0 = por %p4413_p13, %p4412_p12 }
  0x5d   :  { %2500 = vmatpush1.bf16.msra.mxu0 %v3859_v32  ;;  %v4532_v32 = vld [vmem:[#allocation3] sm:$0xff] }
  0x5e   :  { %2541 = vmatpush1.bf16.msra.mxu1 %v3860_v33  ;;  %2501 = vmatprep.subr.bf16.mxu0 %v3861_v47  ;;  %v4534_v33 = vld [vmem:[#allocation3 + $0x8] sm:$0xff]  ;;  %v146_v47 = vunpack.c.h.bf16 %v4530_v31  ;;  %p4415_p1 = pnand %p4414_p0, %p4408_p11 }
  0x5f   :  { %2542 = vmatprep.subr.bf16.mxu1 %v3863_v48  ;;  %v4546_v48 = vld [vmem:[#allocation3 + $0x38] sm:$0xff] }
  0x61   :  { %2502 = vmatpush2.bf16.msra.mxu0 %v3865_v51  ;;  %v136_v51 = vunpack.c.h.bf16 %v4532_v32 }
  0x62   :  { %2543 = vmatpush2.bf16.msra.mxu1 %v3866_v52  ;;  %2503 = vmatprep.subr.bf16.mxu0 %v3867_v63  ;;  %v137_v52 = vunpack.c.l.bf16 %v4534_v33  ;;  %v149_v63 = vunpack.c.l.bf16 %v4546_v48 }
  0x63   :  { %2544 = vmatprep.subr.bf16.mxu1 %v3869_v0  ;;  %v150_v0 = vunpack.c.h.bf16 %v4546_v48 }
  0x65   :  { %2504 = vmatpush2.bf16.msra.mxu0 %v3871_v1 }
  0x66   :  { %2545 = vmatpush2.bf16.msra.mxu1 %v3872_v2  ;;  %2505 = vmatprep.subr.bf16.mxu0 %v3873_v3  ;;  %v4570_v3 = vld [vmem:[#allocation3 + $0x68] sm:$0xff] }
  0x67   :  { %2546 = vmatprep.subr.bf16.mxu1 %v3875_v4  ;;  %v4572_v4 = vld [vmem:[#allocation3 + $0x70] sm:$0xff] }
  0x69   :  { %2506 = vmatpush2.bf16.msra.mxu0 %v3877_v5 }
  0x6a   :  { %2547 = vmatpush2.bf16.msra.mxu1 %v3878_v6  ;;  %2507 = vmatprep.subr.bf16.mxu0 %v3879_v7 }
  0x6b   :  { %2548 = vmatprep.subr.bf16.mxu1 %v3881_v8 }
  0x6d   :  { %2508 = vmatpush2.bf16.msra.mxu0 %v3883_v9  ;;  %v4578_v9 = vld [vmem:[#allocation3 + $0x78] sm:$0xff] }
  0x6e   :  { %2549 = vmatpush2.bf16.msra.mxu1 %v3884_v10  ;;  %2509 = vmatprep.subr.bf16.mxu0 %v3885_v11  ;;  %v4580_v10 = vld [vmem:[#allocation3 + $0x80] sm:$0xff] }
  0x6f   :  { %2550 = vmatprep.subr.bf16.mxu1 %v3887_v12 }
  0x71   :  { %2510 = vmatpush2.bf16.msra.mxu0 %v3889_v13 }
  0x72   :  { %2551 = vmatpush2.bf16.msra.mxu1 %v3890_v14  ;;  %2511 = vmatprep.subr.bf16.mxu0 %v3891_v15  ;;  %v4586_v15 = vld [vmem:[#allocation3 + $0x88] sm:$0xff] }
  0x73   :  { %2552 = vmatprep.subr.bf16.mxu1 %v3893_v16  ;;  %v4588_v16 = vld [vmem:[#allocation3 + $0x90] sm:$0xff] }
  0x75   :  { %2512 = vmatpush2.bf16.msra.mxu0 %v3895_v17 }
  0x76   :  { %2553 = vmatpush2.bf16.msra.mxu1 %v3896_v18  ;;  %2513 = vmatprep.subr.bf16.mxu0 %v3897_v19 }
  0x77   :  { %2554 = vmatprep.subr.bf16.mxu1 %v3899_v20 }
  0x79   :  { %2514 = vmatpush2.bf16.msra.mxu0 %v3901_v21  ;;  %v4594_v21 = vld [vmem:[#allocation3 + $0x98] sm:$0xff] }
  0x7a   :  { %2555 = vmatpush2.bf16.msra.mxu1 %v3902_v22  ;;  %2515 = vmatprep.subr.bf16.mxu0 %v3903_v23  ;;  %v4596_v22 = vld [vmem:[#allocation3 + $0xa0] sm:$0xff] }
  0x7b   :  { %2556 = vmatprep.subr.bf16.mxu1 %v3905_v24 }
  0x7d   :  { %2516 = vmatpush2.bf16.msra.mxu0 %v3907_v25 }
  0x7e   :  { %2557 = vmatpush2.bf16.msra.mxu1 %v3908_v26  ;;  %2567 = vmatprep.subr.bf16.mxu0 %v3911_v27  ;;  %v4602_v27 = vld [vmem:[#allocation3 + $0xa8] sm:$0xff] }
  0x7f   :  { %2608 = vmatprep.subr.bf16.mxu1 %v3914_v28  ;;  %v4604_v28 = vld [vmem:[#allocation3 + $0xb0] sm:$0xff] }
  0xbb   :  { %v107_v43 = vpop.permute.xlu0 %106 }
  0xbc   :  { %vm108_vm0 = vcmp.lt.s32.totalorder %v101_v37, %v107_v43  ;;  %v4538_v37 = vld [vmem:[#allocation3 + $0x10] sm:$0xff]  ;;  %v143_v43 = vunpack.c.l.bf16 %v4528_v30 }
  0xbd   :  { %v3395_v45 = vsel %vm108_vm0, 1.0, %v4445_v44  ;;  %v144_v44 = vunpack.c.h.bf16 %v4528_v30 }
  0xbe   :  { %v199_v49 = vrot.slane %v3395_v45, %v5009_v38  ;;  %v192_v50 = vrot.slane %v3395_v45, %v5010_v40  ;;  %v206_v56 = vrot.slane %v3395_v45, %v5008_v41  ;;  %v213_v57 = vrot.slane %v3395_v45, %v5007_v42 }
  0xbf   :  { %v220_v58 = vrot.slane %v3395_v45, %v5006_v46  ;;  %v227_v59 = vrot.slane %v3395_v45, %v5005_v53  ;;  %v234_v60 = vrot.slane %v3395_v45, %v233_v54  ;;  %v241_v61 = vrot.slane %v3395_v45, %v240_v55  ;;  %v4554_v55 = vld [vmem:[#allocation3 + $0x48] sm:$0xff] }
  0xc0   :  { %201 = vbcast.lane.b32.xlu1 %v199_v49, 256  ;;  %194 = vbcast.lane.b32.xlu0 %v192_v50, 256  ;;  %v145_v45 = vunpack.c.l.bf16 %v4530_v31  ;;  %v4548_v49 = vld [vmem:[#allocation3 + $0x40] sm:$0xff]  ;;  %v135_v50 = vunpack.c.l.bf16 %v4532_v32  ;;  %v138_v54 = vunpack.c.h.bf16 %v4534_v33  ;;  %v153_v5 = vunpack.c.l.bf16 %v4554_v55 }
  0xc1   :  { %v151_v1 = vunpack.c.l.bf16 %v4548_v49  ;;  %v152_v2 = vunpack.c.h.bf16 %v4548_v49  ;;  %v154_v6 = vunpack.c.h.bf16 %v4554_v55 }
  0xc4   :  { %208 = vbcast.lane.b32.xlu1 %v206_v56, 256  ;;  %215 = vbcast.lane.b32.xlu0 %v213_v57, 256  ;;  %v4556_v56 = vld [vmem:[#allocation3 + $0x50] sm:$0xff]  ;;  %v139_v57 = vunpack.c.l.bf16 %v4538_v37 }
  0xc5   :  { %v155_v7 = vunpack.c.l.bf16 %v4556_v56 }
  0xc8   :  { %222 = vbcast.lane.b32.xlu1 %v220_v58, 256  ;;  %229 = vbcast.lane.b32.xlu0 %v227_v59, 256  ;;  %v140_v58 = vunpack.c.h.bf16 %v4538_v37  ;;  %v147_v59 = vunpack.c.l.bf16 %v4540_v39 }
  0xcc   :  { %236 = vbcast.lane.b32.xlu1 %v234_v60, 256  ;;  %243 = vbcast.lane.b32.xlu0 %v241_v61, 256  ;;  %v148_v60 = vunpack.c.h.bf16 %v4540_v39  ;;  %v4562_v61 = vld [vmem:[#allocation3 + $0x58] sm:$0xff] }
  0xd0   :  { %710 = vperm.xlu1 %3812, %v4294_v62   ;;  %v4564_v62 = vld [vmem:[#allocation3 + $0x60] sm:$0xff] }
 0x132   :  { %v202_v25 = vpop.permute.xlu1 %201  ;;  %v195_v24 = vpop.permute.xlu0 %194 }
 0x133   :  { %v251_v42 = vmul.f32 %v202_v25, %v141_v34  ;;  %v252_v38 = vmul.f32 %v202_v25, %v142_v36  ;;  %v253_v40 = vmul.f32 %v202_v25, %v143_v43  ;;  %v254_v26 = vmul.f32 %v202_v25, %v144_v44 }
 0x134   :  { %v255_v23 = vmul.f32 %v202_v25, %v145_v45  ;;  %v256_v53 = vmul.f32 %v202_v25, %v146_v47  ;;  %v245_v32 = vmul.f32 %v195_v24, %v135_v50  ;;  %v246_v46 = vmul.f32 %v195_v24, %v136_v51 }
 0x135   :  { %v329_v41 = vrot.slane %v251_v42, 4  ;;  %v335_v20 = vrot.slane %v252_v38, 4  ;;  %v341_v34 = vrot.slane %v253_v40, 4  ;;  %v347_v19 = vrot.slane %v254_v26, 4 }
 0x136   :  { %v353_v29 = vrot.slane %v255_v23, 4  ;;  %v359_v36 = vrot.slane %v256_v53, 4  ;;  %v247_v43 = vmul.f32 %v195_v24, %v137_v52  ;;  %v248_v30 = vmul.f32 %v195_v24, %v138_v54 }
 0x137   :  { %v330_v44 = vadd.f32 %v329_v41, %v251_v42  ;;  %v336_v18 = vadd.f32 %v335_v20, %v252_v38  ;;  %v342_v45 = vadd.f32 %v341_v34, %v253_v40  ;;  %v348_v17 = vadd.f32 %v347_v19, %v254_v26  ;;  %v4638_v19 = vld [vmem:[#allocation3 + $0xb8] sm:$0xff] }
 0x138   :  { %v354_v31 = vadd.f32 %v353_v29, %v255_v23  ;;  %v360_v47 = vadd.f32 %v359_v36, %v256_v53  ;;  %v249_v50 = vmul.f32 %v195_v24, %v139_v57  ;;  %v250_v51 = vmul.f32 %v195_v24, %v140_v58 }
 0x139   :  { %v331_v25 = vrot.slane %v330_v44, 2  ;;  %v337_v14 = vrot.slane %v336_v18, 2  ;;  %v343_v13 = vrot.slane %v342_v45, 2  ;;  %v349_v12 = vrot.slane %v348_v17, 2 }
 0x13a   :  { %v355_v52 = vrot.slane %v354_v31, 2  ;;  %v361_v11 = vrot.slane %v360_v47, 2  ;;  %v293_v33 = vrot.slane %v245_v32, 4  ;;  %v299_v54 = vrot.slane %v246_v46, 4 }
 0x13b   :  { %v332_v41 = vadd.f32 %v331_v25, %v330_v44  ;;  %v338_v38 = vadd.f32 %v337_v14, %v336_v18  ;;  %v344_v40 = vadd.f32 %v343_v13, %v342_v45  ;;  %v350_v42 = vadd.f32 %v349_v12, %v348_v17  ;;  %v209_v17 = vpop.permute.xlu1 %208 }
 0x13c   :  { %v356_v53 = vadd.f32 %v355_v52, %v354_v31  ;;  %v362_v20 = vadd.f32 %v361_v11, %v360_v47  ;;  %v294_v57 = vadd.f32 %v293_v33, %v245_v32  ;;  %v300_v23 = vadd.f32 %v299_v54, %v246_v46 }
 0x13d   :  { %v333_v37 = vrot.slane %v332_v41, 1  ;;  %v339_v58 = vrot.slane %v338_v38, 1  ;;  %v345_v24 = vrot.slane %v344_v40, 1  ;;  %v351_v26 = vrot.slane %v350_v42, 1 }
 0x13e   :  { %v295_v34 = vrot.slane %v294_v57, 2  ;;  %v301_v29 = vrot.slane %v300_v23, 2  ;;  %v357_v12 = vrot.slane %v356_v53, 1  ;;  %v363_v14 = vrot.slane %v362_v20, 1 }
 0x13f   :  { %v4642_v44 = vadd.f32 %v333_v37, %v332_v41  ;;  %v4644_v13 = vadd.f32 %v339_v58, %v338_v38  ;;  %v4646_v11 = vadd.f32 %v345_v24, %v344_v40  ;;  %v4648_v46 = vadd.f32 %v351_v26, %v350_v42 }
 0x140   :  { %v296_v18 = vadd.f32 %v295_v34, %v294_v57  ;;  %v302_v32 = vadd.f32 %v301_v29, %v300_v23  ;;  %v305_v45 = vrot.slane %v247_v43, 4  ;;  %v311_v31 = vrot.slane %v248_v30, 4 }
 0x141   :  { %v317_v47 = vrot.slane %v249_v50, 4  ;;  %v323_v25 = vrot.slane %v250_v51, 4  ;;  %v257_v54 = vmul.f32 %v209_v17, %v147_v59  ;;  %v258_v41 = vmul.f32 %v209_v17, %v148_v60 }
 0x142   :  { %v297_v52 = vrot.slane %v296_v18, 1  ;;  %v303_v33 = vrot.slane %v302_v32, 1  ;;  %v306_v38 = vadd.f32 %v305_v45, %v247_v43  ;;  %v312_v40 = vadd.f32 %v311_v31, %v248_v30 }
 0x143   :  { %v318_v37 = vadd.f32 %v317_v47, %v249_v50  ;;  %v324_v42 = vadd.f32 %v323_v25, %v250_v51  ;;  %v358_v58 = vadd.f32 %v357_v12, %v356_v53  ;;  %v4654_v57 = vadd.f32 %v363_v14, %v362_v20 }
 0x144   :  { %v259_v23 = vmul.f32 %v209_v17, %v149_v63  ;;  %v260_v24 = vmul.f32 %v209_v17, %v150_v0  ;;  %v307_v26 = vrot.slane %v306_v38, 2  ;;  %v313_v34 = vrot.slane %v312_v40, 2 }
 0x145   :  { %v319_v29 = vrot.slane %v318_v37, 2  ;;  %v325_v59 = vrot.slane %v324_v42, 2  ;;  %v4660_v8 = vadd.f32 %v297_v52, %v296_v18  ;;  %v4662_v39 = vadd.f32 %v303_v33, %v302_v32  ;;  %v216_v52 = vpop.permute.xlu0 %215 }
 0x146   :  { %v365_v60 = vrot.slane %v257_v54, 4  ;;  %v371_v43 = vrot.slane %v258_v41, 4  ;;  %v308_v30 = vadd.f32 %v307_v26, %v306_v38  ;;  %v314_v50 = vadd.f32 %v313_v34, %v312_v40 }
 0x147   :  { %v320_v51 = vadd.f32 %v319_v29, %v318_v37  ;;  %v326_v53 = vadd.f32 %v325_v59, %v324_v42  ;;  %v377_v63 = vrot.slane %v259_v23, 4  ;;  %v383_v14 = vrot.slane %v260_v24, 4 }
 0x148   :  { %v366_v20 = vadd.f32 %v365_v60, %v257_v54  ;;  %v372_v12 = vadd.f32 %v371_v43, %v258_v41  ;;  %v309_v48 = vrot.slane %v308_v30, 1  ;;  %v261_v45 = vmul.f32 %v209_v17, %v151_v1 }
 0x149   :  { %v321_v0 = vrot.slane %v320_v51, 1  ;;  %v262_v18 = vmul.f32 %v209_v17, %v152_v2  ;;  %v378_v47 = vadd.f32 %v377_v63, %v259_v23  ;;  %v384_v25 = vadd.f32 %v383_v14, %v260_v24 }
 0x14a   :  { %v367_v32 = vrot.slane %v366_v20, 2  ;;  %v373_v31 = vrot.slane %v372_v12, 2  ;;  %v4668_v33 = vadd.f32 %v309_v48, %v308_v30  ;;  %v315_v38 = vrot.slane %v314_v50, 1 }
 0x14b   :  { %v322_v54 = vadd.f32 %v321_v0, %v320_v51  ;;  %v327_v41 = vrot.slane %v326_v53, 1  ;;  %v379_v42 = vrot.slane %v378_v47, 2  ;;  %v385_v26 = vrot.slane %v384_v25, 2 }
 0x14c   :  { %v368_v40 = vadd.f32 %v367_v32, %v366_v20  ;;  %v374_v37 = vadd.f32 %v373_v31, %v372_v12  ;;  %v389_v1 = vrot.slane %v261_v45, 4  ;;  %v395_v49 = vrot.slane %v262_v18, 4 }
 0x14d   :  { %v4671_v34 = vsel %vm629_vm1, %v358_v58, %v322_v54  ;;  %v263_v2 = vmul.f32 %v216_v52, %v153_v5  ;;  %v380_v24 = vadd.f32 %v379_v42, %v378_v47  ;;  %v386_v29 = vadd.f32 %v385_v26, %v384_v25 }
 0x14e   :  { %5018 = vst [vmem:[#allocation18_spill] sm:$0xff] %v4671_v34  ;;  %v369_v17 = vrot.slane %v368_v40, 1  ;;  %v375_v23 = vrot.slane %v374_v37, 1  ;;  %v390_v59 = vadd.f32 %v389_v1, %v261_v45  ;;  %v396_v60 = vadd.f32 %v395_v49, %v262_v18 }
 0x14f   :  { %v264_v43 = vmul.f32 %v216_v52, %v154_v6  ;;  %v265_v30 = vmul.f32 %v216_v52, %v155_v7  ;;  %v4679_v51 = vadd.f32 %v315_v38, %v314_v50  ;;  %v4681_v58 = vadd.f32 %v327_v41, %v326_v53 }
 0x150   :  { %v381_v20 = vrot.slane %v380_v24, 1  ;;  %v387_v12 = vrot.slane %v386_v29, 1  ;;  %v391_v63 = vrot.slane %v390_v59, 2  ;;  %v397_v5 = vrot.slane %v396_v60, 2 }
 0x151   :  { %v5019_v14 = vunpack.c.h.bf16 %v4556_v56  ;;  %v5020_v0 = vunpack.c.l.bf16 %v4562_v61  ;;  %v4687_v18 = vadd.f32 %v369_v17, %v368_v40  ;;  %v4689_v55 = vadd.f32 %v375_v23, %v374_v37 }
 0x152   :  { %v5021_v6 = vunpack.c.h.bf16 %v4562_v61  ;;  %v401_v50 = vrot.slane %v263_v2, 4  ;;  %v392_v53 = vadd.f32 %v391_v63, %v390_v59  ;;  %v398_v32 = vadd.f32 %v397_v5, %v396_v60 }
 0x153   :  { %v266_v48 = vmul.f32 %v216_v52, %v5019_v14  ;;  %v267_v45 = vmul.f32 %v216_v52, %v5020_v0  ;;  %v407_v31 = vrot.slane %v264_v43, 4  ;;  %v413_v47 = vrot.slane %v265_v30, 4 }
 0x154   :  { %v268_v7 = vmul.f32 %v216_v52, %v5021_v6  ;;  %v402_v25 = vadd.f32 %v401_v50, %v263_v2  ;;  %v4693_v41 = vadd.f32 %v381_v20, %v380_v24  ;;  %v4695_v42 = vadd.f32 %v387_v12, %v386_v29  ;;  %v223_v52 = vpop.permute.xlu1 %222 }
 0x155   :  { %v419_v38 = vrot.slane %v266_v48, 4  ;;  %v425_v54 = vrot.slane %v267_v45, 4  ;;  %v408_v40 = vadd.f32 %v407_v31, %v264_v43  ;;  %v414_v26 = vadd.f32 %v413_v47, %v265_v30 }
 0x156   :  { %v431_v56 = vrot.slane %v268_v7, 4  ;;  %v403_v37 = vrot.slane %v402_v25, 2  ;;  %v393_v17 = vrot.slane %v392_v53, 1  ;;  %v399_v23 = vrot.slane %v398_v32, 1 }
 0x157   :  { %v420_v1 = vadd.f32 %v419_v38, %v266_v48  ;;  %v426_v49 = vadd.f32 %v425_v54, %v267_v45  ;;  %v409_v59 = vrot.slane %v408_v40, 2  ;;  %v415_v60 = vrot.slane %v414_v26, 2 }
 0x158   :  { %v432_v61 = vadd.f32 %v431_v56, %v268_v7  ;;  %v404_v63 = vadd.f32 %v403_v37, %v402_v25  ;;  %v5022_v29 = vunpack.c.l.bf16 %v4564_v62  ;;  %v5023_v43 = vunpack.c.h.bf16 %v4564_v62 }
 0x159   :  { %v421_v2 = vrot.slane %v420_v1, 2  ;;  %v427_v5 = vrot.slane %v426_v49, 2  ;;  %v410_v0 = vadd.f32 %v409_v59, %v408_v40  ;;  %v416_v24 = vadd.f32 %v415_v60, %v414_v26  ;;  %v230_v60 = vpop.permute.xlu0 %229 }
 0x15a   :  { %v433_v14 = vrot.slane %v432_v61, 2  ;;  %v269_v20 = vmul.f32 %v223_v52, %v5022_v29  ;;  %v270_v30 = vmul.f32 %v223_v52, %v5023_v43  ;;  %v405_v12 = vrot.slane %v404_v63, 1 }
 0x15b   :  { %v422_v48 = vadd.f32 %v421_v2, %v420_v1  ;;  %v428_v45 = vadd.f32 %v427_v5, %v426_v49  ;;  %v411_v7 = vrot.slane %v410_v0, 1  ;;  %v417_v50 = vrot.slane %v416_v24, 1 }
 0x15c   :  { %v434_v6 = vadd.f32 %v433_v14, %v432_v61  ;;  %v5024_v31 = vunpack.c.l.bf16 %v4570_v3  ;;  %v5025_v25 = vunpack.c.h.bf16 %v4570_v3  ;;  %v4705_v54 = vadd.f32 %v393_v17, %v392_v53 }
 0x15d   :  { %v4707_v56 = vadd.f32 %v399_v23, %v398_v32  ;;  %v4709_v40 = vadd.f32 %v405_v12, %v404_v63  ;;  %v423_v62 = vrot.slane %v422_v48, 1  ;;  %v429_v26 = vrot.slane %v428_v45, 1 }
 0x15e   :  { %v271_v47 = vmul.f32 %v223_v52, %v5024_v31  ;;  %v272_v38 = vmul.f32 %v223_v52, %v5025_v25  ;;  %5026 = vst [vmem:[#allocation19_spill] sm:$0xff] %v4705_v54  ;;  %v435_v37 = vrot.slane %v434_v6, 1  ;;  %v5028_v1 = vunpack.c.l.bf16 %v4572_v4 }
 0x15f   :  { %5027 = vst [vmem:[#allocation20_spill] sm:$0xff] %v4707_v56  ;;  %v5029_v61 = vunpack.c.h.bf16 %v4572_v4  ;;  %v4715_v2 = vadd.f32 %v411_v7, %v410_v0  ;;  %v4717_v3 = vadd.f32 %v417_v50, %v416_v24  ;;  %v4719_v53 = vadd.f32 %v423_v62, %v422_v48 }
 0x160   :  { %v273_v49 = vmul.f32 %v223_v52, %v5028_v1  ;;  %v437_v32 = vrot.slane %v269_v20, 4  ;;  %v443_v17 = vrot.slane %v270_v30, 4  ;;  %v449_v23 = vrot.slane %v271_v47, 4 }
 0x161   :  { %v274_v59 = vmul.f32 %v223_v52, %v5029_v61  ;;  %v455_v63 = vrot.slane %v272_v38, 4  ;;  %v5030_v43 = vunpack.c.l.bf16 %v4578_v9  ;;  %v5031_v4 = vunpack.c.h.bf16 %v4578_v9 }
 0x162   :  { %v461_v5 = vrot.slane %v273_v49, 4  ;;  %v438_v14 = vadd.f32 %v437_v32, %v269_v20  ;;  %v444_v31 = vadd.f32 %v443_v17, %v270_v30  ;;  %v450_v0 = vadd.f32 %v449_v23, %v271_v47 }
 0x163   :  { %v467_v29 = vrot.slane %v274_v59, 4  ;;  %v275_v12 = vmul.f32 %v230_v60, %v5030_v43  ;;  %v276_v52 = vmul.f32 %v230_v60, %v5031_v4  ;;  %v456_v7 = vadd.f32 %v455_v63, %v272_v38 }
 0x164   :  { %v462_v24 = vadd.f32 %v461_v5, %v273_v49  ;;  %v439_v50 = vrot.slane %v438_v14, 2  ;;  %v5032_v25 = vunpack.c.l.bf16 %v4580_v10  ;;  %v5033_v1 = vunpack.c.h.bf16 %v4580_v10 }
 0x165   :  { %v468_v48 = vadd.f32 %v467_v29, %v274_v59  ;;  %v445_v20 = vrot.slane %v444_v31, 2  ;;  %v451_v32 = vrot.slane %v450_v0, 2  ;;  %v457_v36 = vrot.slane %v456_v7, 2 }
 0x166   :  { %v277_v62 = vmul.f32 %v230_v60, %v5032_v25  ;;  %v278_v61 = vmul.f32 %v230_v60, %v5033_v1  ;;  %v463_v35 = vrot.slane %v462_v24, 2  ;;  %v4729_v43 = vadd.f32 %v439_v50, %v438_v14 }
 0x167   :  { %v469_v9 = vrot.slane %v468_v48, 2  ;;  %v5034_v30 = vunpack.c.l.bf16 %v4586_v15  ;;  %v5035_v38 = vunpack.c.h.bf16 %v4586_v15  ;;  %v4735_v59 = vadd.f32 %v445_v20, %v444_v31  ;;  %v237_v31 = vpop.permute.xlu1 %236 }
 0x168   :  { %v4737_v17 = vadd.f32 %v451_v32, %v450_v0  ;;  %v4739_v23 = vadd.f32 %v457_v36, %v456_v7  ;;  %v4741_v10 = vadd.f32 %v463_v35, %v462_v24  ;;  %v4743_v63 = vadd.f32 %v429_v26, %v428_v45 }
 0x169   :  { %v279_v47 = vmul.f32 %v230_v60, %v5034_v30  ;;  %v280_v49 = vmul.f32 %v230_v60, %v5035_v38  ;;  %v4745_v5 = vadd.f32 %v435_v37, %v434_v6  ;;  %v473_v14 = vrot.slane %v275_v12, 4 }
 0x16a   :  { %5036 = vst [vmem:[#allocation21_spill] sm:$0xff] %v4741_v10  ;;  %5037 = vst [vmem:[#allocation22_spill] sm:$0xff] %v4743_v63  ;;  %v479_v29 = vrot.slane %v276_v52, 4  ;;  %v4750_v60 = vadd.f32 %v469_v9, %v468_v48  ;;  %v485_v7 = vrot.slane %v277_v62, 4  ;;  %v491_v6 = vrot.slane %v278_v61, 4 }
 0x16b   :  { %5038 = vst [vmem:[#allocation23_spill] sm:$0xff] %v4745_v5  ;;  %v474_v0 = vadd.f32 %v473_v14, %v275_v12  ;;  %v497_v26 = vrot.slane %v279_v47, 4  ;;  %v503_v37 = vrot.slane %v280_v49, 4  ;;  %v5039_v20 = vunpack.c.l.bf16 %v4588_v16 }
 0x16c   :  { %v480_v35 = vadd.f32 %v479_v29, %v276_v52  ;;  %v486_v1 = vadd.f32 %v485_v7, %v277_v62  ;;  %v492_v30 = vadd.f32 %v491_v6, %v278_v61  ;;  %v5040_v38 = vunpack.c.h.bf16 %v4588_v16 }
 0x16d   :  { %v475_v24 = vrot.slane %v474_v0, 2  ;;  %v281_v32 = vmul.f32 %v237_v31, %v5039_v20  ;;  %v498_v48 = vadd.f32 %v497_v26, %v279_v47  ;;  %v504_v9 = vadd.f32 %v503_v37, %v280_v49 }
 0x16e   :  { %v481_v25 = vrot.slane %v480_v35, 2  ;;  %v282_v15 = vmul.f32 %v237_v31, %v5040_v38  ;;  %v487_v14 = vrot.slane %v486_v1, 2  ;;  %v5041_v29 = vunpack.c.l.bf16 %v4594_v21 }
 0x16f   :  { %v4759_v52 = vadd.f32 %v475_v24, %v474_v0  ;;  %v493_v4 = vrot.slane %v492_v30, 2  ;;  %v499_v36 = vrot.slane %v498_v48, 2  ;;  %v505_v62 = vrot.slane %v504_v9, 2 }
 0x170   :  { %v283_v45 = vmul.f32 %v237_v31, %v5041_v29  ;;  %v5042_v7 = vunpack.c.h.bf16 %v4594_v21  ;;  %v482_v61 = vadd.f32 %v481_v25, %v480_v35  ;;  %v5043_v47 = vunpack.c.l.bf16 %v4596_v22  ;;  %v244_v29 = vpop.permute.xlu0 %243 }
 0x171   :  { %v5044_v16 = vunpack.c.h.bf16 %v4596_v22  ;;  %v509_v26 = vrot.slane %v281_v32, 4  ;;  %v4769_v0 = vadd.f32 %v487_v14, %v486_v1  ;;  %v4771_v37 = vadd.f32 %v493_v4, %v492_v30 }
 0x172   :  { %v284_v20 = vmul.f32 %v237_v31, %v5042_v7  ;;  %v285_v49 = vmul.f32 %v237_v31, %v5043_v47  ;;  %v4773_v24 = vadd.f32 %v499_v36, %v498_v48  ;;  %v515_v38 = vrot.slane %v282_v15, 4 }
 0x173   :  { %v286_v6 = vmul.f32 %v237_v31, %v5044_v16  ;;  %v4775_v12 = vadd.f32 %v509_v26, %v281_v32  ;;  %v521_v21 = vrot.slane %v283_v45, 4  ;;  %v4778_v47 = vadd.f32 %v505_v62, %v504_v9 }
 0x174   :  { %5045 = vst [vmem:[#allocation24_spill] sm:$0xff] %v4773_v24  ;;  %v527_v7 = vrot.slane %v284_v20, 4  ;;  %v533_v35 = vrot.slane %v285_v49, 4  ;;  %v516_v22 = vadd.f32 %v515_v38, %v282_v15  ;;  %v5046_v36 = vunpack.c.l.bf16 %v4602_v27 }
 0x175   :  { %v539_v31 = vrot.slane %v286_v6, 4  ;;  %v4780_v16 = vadd.f32 %v521_v21, %v283_v45  ;;  %v5047_v26 = vunpack.c.h.bf16 %v4602_v27  ;;  %v5048_v62 = vunpack.c.l.bf16 %v4604_v28 }
 0x176   :  { %v528_v1 = vadd.f32 %v527_v7, %v284_v20  ;;  %v534_v4 = vadd.f32 %v533_v35, %v285_v49  ;;  %v287_v30 = vmul.f32 %v244_v29, %v5046_v36  ;;  %v517_v48 = vrot.slane %v516_v22, 2 }
 0x177   :  { %v4785_v14 = vadd.f32 %v539_v31, %v286_v6  ;;  %v288_v25 = vmul.f32 %v244_v29, %v5047_v26  ;;  %v289_v20 = vmul.f32 %v244_v29, %v5048_v62  ;;  %v5049_v38 = vunpack.c.h.bf16 %v4604_v28 }
 0x178   :  { %v529_v9 = vrot.slane %v528_v1, 2  ;;  %v535_v45 = vrot.slane %v534_v4, 2  ;;  %v5050_v6 = vunpack.c.l.bf16 %v4638_v19  ;;  %v5051_v27 = vunpack.c.h.bf16 %v4638_v19 }
 0x179   :  { %v290_v21 = vmul.f32 %v244_v29, %v5049_v38  ;;  %v545_v36 = vrot.slane %v287_v30, 4  ;;  %v551_v26 = vrot.slane %v288_v25, 4  ;;  %v557_v15 = vrot.slane %v289_v20, 4 }
 0x17a   :  { %v291_v7 = vmul.f32 %v244_v29, %v5050_v6  ;;  %v292_v35 = vmul.f32 %v244_v29, %v5051_v27  ;;  %v4799_v31 = vadd.f32 %v535_v45, %v534_v4  ;;  %v5052_v28 = vrot.slane %v4735_v59, 1 }
 0x17b   :  { %v563_v62 = vrot.slane %v290_v21, 4  ;;  %v546_v49 = vadd.f32 %v545_v36, %v287_v30  ;;  %v552_v6 = vadd.f32 %v551_v26, %v288_v25  ;;  %v4804_v63 = vadd.f32 %v557_v15, %v289_v20  ;;  %v4829_v36 = vpop.permute.xlu1 %710 }
 0x17c   :  { %v569_v32 = vrot.slane %v291_v7, 4  ;;  %v575_v50 = vrot.slane %v292_v35, 4  ;;  %v448_v38 = vadd.f32 %v5052_v28, %v4735_v59  ;;  %v483_v19 = vrot.slane %v482_v61, 1 }
 0x17d   :  { %v564_v29 = vadd.f32 %v563_v62, %v290_v21  ;;  %v518_v27 = vadd.f32 %v517_v48, %v516_v22  ;;  %v547_v54 = vrot.slane %v546_v49, 2  ;;  %v553_v34 = vrot.slane %v552_v6, 2 }
 0x17e   :  { %v570_v4 = vadd.f32 %v569_v32, %v291_v7  ;;  %v4806_v45 = vadd.f32 %v575_v50, %v292_v35  ;;  %v559_v24 = vrot.slane %v4804_v63, 2  ;;  %v484_v5 = vadd.f32 %v483_v19, %v482_v61 }
 0x17f   :  { %v565_v10 = vrot.slane %v564_v29, 2  ;;  %v519_v28 = vrot.slane %v518_v27, 1  ;;  %v554_v30 = vadd.f32 %v553_v34, %v552_v6  ;;  %v643_v25 = vsel %vm629_vm1, %v4644_v13, %v4662_v39 }
 0x180   :  { %v571_v56 = vrot.slane %v570_v4, 2  ;;  %v577_v59 = vrot.slane %v4806_v45, 2  ;;  %v5053_v50 = vrot.slane %v4739_v23, 1  ;;  %v495_v22 = vrot.slane %v4771_v37, 1 }
 0x181   :  { %v520_v15 = vadd.f32 %v519_v28, %v518_v27  ;;  %v644_v61 = vsel %vm631_vm2, %v4689_v55, %v643_v25  ;;  %v530_v20 = vadd.f32 %v529_v9, %v528_v1  ;;  %v555_v21 = vrot.slane %v554_v30, 1 }
 0x182   :  { %v460_v32 = vadd.f32 %v5053_v50, %v4739_v23  ;;  %v4817_v48 = vadd.f32 %v571_v56, %v570_v4  ;;  %v645_v34 = vsel %vm633_vm3, %v4715_v2, %v644_v61  ;;  %v496_v7 = vadd.f32 %v495_v22, %v4771_v37 }
 0x183   :  { %v566_v13 = vadd.f32 %v565_v10, %v564_v29  ;;  %v646_v23 = vsel %vm635_vm4, %v448_v38, %v645_v34  ;;  %v531_v35 = vrot.slane %v530_v20, 1  ;;  %v657_v56 = vsel %vm629_vm1, %v4648_v46, %v4679_v51 }
 0x184   :  { %v573_v39 = vrot.slane %v4817_v48, 1  ;;  %v556_v55 = vadd.f32 %v555_v21, %v554_v30  ;;  %v647_v1 = vsel %vm637_vm5, %v484_v5, %v646_v23  ;;  %v658_v2 = vsel %vm631_vm2, %v4695_v42, %v657_v56 }
 0x185   :  { %v567_v9 = vrot.slane %v566_v13, 1  ;;  %v648_v10 = vsel %vm639_vm6, %v520_v15, %v647_v1  ;;  %v532_v37 = vadd.f32 %v531_v35, %v530_v20  ;;  %v659_v26 = vsel %vm633_vm3, %v4719_v53, %v658_v2 }
 0x186   :  { %v5054_v62 = vrot.slane %v4729_v43, 1  ;;  %v649_v46 = vsel %vm641_vm7, %v556_v55, %v648_v10  ;;  %v660_v6 = vsel %vm635_vm4, %v460_v32, %v659_v26  ;;  %v477_v5 = vrot.slane %v4759_v52, 1 }
 0x187   :  { %v568_v51 = vadd.f32 %v567_v9, %v566_v13  ;;  %v714_v19 = vmul.f32 %v4829_v36, %v649_v46  ;;  %v661_v42 = vsel %vm637_vm5, %v496_v7, %v660_v6  ;;  %v5055_v29 = vrot.slane %v4775_v12, 2 }
 0x188   :  { %v442_v38 = vadd.f32 %v5054_v62, %v4729_v43  ;;  %v548_v53 = vadd.f32 %v547_v54, %v546_v49  ;;  %v662_v27 = vsel %vm639_vm6, %v532_v37, %v661_v42  ;;  %v478_v43 = vadd.f32 %v477_v5, %v4759_v52  ;;  %v3909_v37 = vld [vmem:[#allocation6 + $0x750] ss:$24 sps:$4 sm:$0xff]   ;;  %v3917_v5 = vld [vmem:[#allocation6 + $0x724] ss:$24 sps:$4 sm:$0xff]  }
 0x189   :  { %v512_v4 = vadd.f32 %v5055_v29, %v4775_v12  ;;  %v630_v28 = vsel %vm629_vm1, %v4642_v44, %v4660_v8  ;;  %v5056_v30 = vrot.slane %v4737_v17, 1  ;;  %v4856_v50 = vpack.c.bf16 %v714_v19, %v714_v19 }
 0x18a   :  { %v663_v32 = vsel %vm641_vm7, %v568_v51, %v662_v27  ;;  %v549_v15 = vrot.slane %v548_v53, 1  ;;  %v632_v12 = vsel %vm631_vm2, %v4687_v18, %v630_v28  ;;  %v489_v52 = vrot.slane %v4769_v0, 1 }
 0x18b   :  { %v454_v25 = vadd.f32 %v5056_v30, %v4737_v17  ;;  %v513_v22 = vrot.slane %v512_v4, 1  ;;  %v716_v54 = vmul.f32 %v4829_v36, %v663_v32  ;;  %v5057_v8 = vrot.slane %v4780_v16, 2  ;;  %2517 = vmatprep.mubr.bf16.mxu0 %v4856_v50 }
 0x18c   :  { %v550_v49 = vadd.f32 %v549_v15, %v548_v53  ;;  %v634_v61 = vsel %vm633_vm3, %v4709_v40, %v632_v12  ;;  %v560_v20 = vadd.f32 %v559_v24, %v4804_v63  ;;  %v490_v18 = vadd.f32 %v489_v52, %v4769_v0  ;;  %v5066_v15 = vld [vmem:[#allocation18_spill] sm:$0xff] }
 0x18d   :  { %v524_v44 = vadd.f32 %v5057_v8, %v4780_v16  ;;  %v514_v17 = vadd.f32 %v513_v22, %v512_v4  ;;  %v4870_v21 = vpack.c.bf16 %v716_v54, %v716_v54  ;;  %v636_v34 = vsel %vm635_vm4, %v442_v38, %v634_v61  ;;  %v5063_v4 = vld [vmem:[#allocation23_spill] sm:$0xff]  ;;  %v5068_v61 = vld [vmem:[#allocation22_spill] sm:$0xff] }
 0x18e   :  { %v638_v13 = vsel %vm637_vm5, %v478_v43, %v636_v34  ;;  %v561_v23 = vrot.slane %v560_v20, 1  ;;  %v650_v16 = vsel %vm629_vm1, %v4646_v11, %v4668_v33  ;;  %v5058_v35 = vrot.slane %v4750_v60, 1  ;;  %v5067_v54 = vld [vmem:[#allocation19_spill] sm:$0xff]  ;;  %v3923_v34 = vld [vmem:[#allocation6 + $0x6f4] ss:$24 sps:$4 sm:$0xff]  }
 0x18f   :  { %v525_v7 = vrot.slane %v524_v44, 1  ;;  %2558 = vmatprep.mubr.bf16.mxu1 %v4870_v21  ;;  %v640_v63 = vsel %vm639_vm6, %v514_v17, %v638_v13  ;;  %v651_v0 = vsel %vm631_vm2, %v4693_v41, %v650_v16  ;;  %v507_v56 = vrot.slane %v4778_v47, 1  ;;  %v3920_v17 = vld [vmem:[#allocation6 + $0x12c] ss:$24 sps:$4 sm:$0xff]   ;;  %v3921_v16 = vld [vmem:[#allocation6 + $0x6f0] ss:$24 sps:$4 sm:$0xff]  }
 0x190   :  { %v472_v40 = vadd.f32 %v5058_v35, %v4750_v60  ;;  %v642_v55 = vsel %vm641_vm7, %v550_v49, %v640_v63  ;;  %v562_v1 = vadd.f32 %v561_v23, %v560_v20  ;;  %v652_v11 = vsel %vm633_vm3, %v4717_v3, %v651_v0  ;;  %v3918_v23 = vld [vmem:[#allocation6 + $0x128] ss:$24 sps:$4 sm:$0xff]   ;;  %v3926_v35 = vld [vmem:[#allocation6 + $0xfc] ss:$24 sps:$4 sm:$0xff]   ;;  %v3924_v0 = vld [vmem:[#allocation6 + $0xf8] ss:$24 sps:$4 sm:$0xff]  }
 0x191   :  { %v526_v24 = vadd.f32 %v525_v7, %v524_v44  ;;  %v5059_v33 = vrot.slane %v4785_v14, 2  ;;  %v713_v9 = vmul.f32 %v4829_v36, %v642_v55  ;;  %v653_v2 = vsel %vm635_vm4, %v454_v25, %v652_v11  ;;  %v3912_v25 = vld [vmem:[#allocation6 + $0x158] ss:$24 sps:$4 sm:$0xff]   ;;  %v3929_v63 = vld [vmem:[#allocation6 + $0x6c4] ss:$24 sps:$4 sm:$0xff]  }
 0x192   :  { %v508_v10 = vadd.f32 %v507_v56, %v4778_v47  ;;  %v578_v41 = vadd.f32 %v577_v59, %v4806_v45  ;;  %v654_v26 = vsel %vm637_vm5, %v490_v18, %v653_v2  ;;  %v671_v3 = vsel %vm629_vm1, %v4654_v57, %v4681_v58  ;;  %v5060_v47 = vld [vmem:[#allocation20_spill] sm:$0xff]  ;;  %v5061_v45 = vld [vmem:[#allocation21_spill] sm:$0xff]  ;;  %v3915_v44 = vld [vmem:[#allocation6 + $0x720] ss:$24 sps:$4 sm:$0xff]  }
 0x193   :  { %v542_v60 = vadd.f32 %v5059_v33, %v4785_v14  ;;  %v537_v14 = vrot.slane %v4799_v31, 1  ;;  %v4903_v38 = vpack.c.bf16 %v713_v9, %v713_v9  ;;  %v655_v46 = vsel %vm639_vm6, %v526_v24, %v654_v26  ;;  %v5064_v58 = vld [vmem:[#allocation24_spill] sm:$0xff]  ;;  %v3927_v56 = vld [vmem:[#allocation6 + $0x6c0] ss:$24 sps:$4 sm:$0xff]   ;;  %v3941_v9 = vld [vmem:[#allocation6 + $0x664] ss:$24 sps:$4 sm:$0xff]  }
 0x194   :  { %v579_v51 = vrot.slane %v578_v41, 1  ;;  %v672_v6 = vsel %vm631_vm2, %v5060_v47, %v671_v3  ;;  %v5062_v59 = vrot.slane %v5061_v45, 1  ;;  %v656_v42 = vsel %vm641_vm7, %v562_v1, %v655_v46  ;;  %v3932_v55 = vld [vmem:[#allocation6 + $0xcc] ss:$24 sps:$4 sm:$0xff]   ;;  %v3930_v11 = vld [vmem:[#allocation6 + $0xc8] ss:$24 sps:$4 sm:$0xff]  }
 0x195   :  { %v543_v62 = vrot.slane %v542_v60, 1  ;;  %v673_v57 = vsel %vm633_vm3, %v5063_v4, %v672_v6  ;;  %v5065_v53 = vrot.slane %v5064_v58, 1  ;;  %2518 = vmatmul.mubr.bf16.vlgmr.msra.gmra.mxu0 %v4903_v38  ;;  %v715_v43 = vmul.f32 %v4829_v36, %v656_v42  ;;  %v3935_v1 = vld [vmem:[#allocation6 + $0x694] ss:$24 sps:$4 sm:$0xff]   ;;  %v3933_v33 = vld [vmem:[#allocation6 + $0x690] ss:$24 sps:$4 sm:$0xff]  }
 0x196   :  { %v466_v19 = vadd.f32 %v5062_v59, %v5061_v45  ;;  %v580_v28 = vadd.f32 %v579_v51, %v578_v41  ;;  %v674_v30 = vsel %vm635_vm4, %v472_v40, %v673_v57  ;;  %2568 = vmatpush1.bf16.msra.mxu0 %v3909_v37  ;;  %v538_v22 = vadd.f32 %v537_v14, %v4799_v31  ;;  %v3939_v2 = vld [vmem:[#allocation6 + $0x660] ss:$24 sps:$4 sm:$0xff]   ;;  %v3947_v41 = vld [vmem:[#allocation6 + $0x634] ss:$24 sps:$4 sm:$0xff]   ;;  %v3945_v26 = vld [vmem:[#allocation6 + $0x630] ss:$24 sps:$4 sm:$0xff]  }
 0x197   :  { %v544_v29 = vadd.f32 %v543_v62, %v542_v60  ;;  %v502_v27 = vadd.f32 %v5065_v53, %v5064_v58  ;;  %v675_v32 = vsel %vm637_vm5, %v508_v10, %v674_v30  ;;  %v665_v12 = vsel %vm631_vm2, %v5067_v54, %v5066_v15  ;;  %2569 = vmatprep.subr.bf16.mxu0 %v3917_v5  ;;  %v3938_v60 = vld [vmem:[#allocation6 + $0x9c] ss:$24 sps:$4 sm:$0xff]   ;;  %v3944_v10 = vld [vmem:[#allocation6 + $0x6c] ss:$24 sps:$4 sm:$0xff]   ;;  %v3942_v37 = vld [vmem:[#allocation6 + $0x68] ss:$24 sps:$4 sm:$0xff]  }
 0x198   :  { %v4925_v52 = vpack.c.bf16 %v715_v43, %v715_v43  ;;  %v574_v49 = vadd.f32 %v573_v39, %v4817_v48  ;;  %v666_v20 = vsel %vm633_vm3, %v5068_v61, %v665_v12  ;;  %v3950_v62 = vld [vmem:[#allocation6 + $0x3c] ss:$24 sps:$4 sm:$0xff]   ;;  %v3948_v14 = vld [vmem:[#allocation6 + $0x38] ss:$24 sps:$4 sm:$0xff]   ;;  %v3956_v51 = vld [vmem:[#allocation6 + $0xc] ss:$24 sps:$4 sm:$0xff]  }
 0x199   :  { %v676_v8 = vsel %vm639_vm6, %v544_v29, %v675_v32  ;;  %v667_v18 = vsel %vm635_vm4, %v466_v19, %v666_v20  ;;  %v3953_v3 = vld [vmem:[#allocation6 + $0x604] ss:$24 sps:$4 sm:$0xff]   ;;  %v3951_v46 = vld [vmem:[#allocation6 + $0x600] ss:$24 sps:$4 sm:$0xff]   ;;  %v3959_v47 = vld [vmem:[#allocation6 + $0x8d4] ss:$24 sps:$4 sm:$0xff]  }
 0x19a   :  { %v677_v31 = vsel %vm641_vm7, %v580_v28, %v676_v8  ;;  %2559 = vmatmul.mubr.bf16.vlgmr.msra.gmra.mxu1 %v4925_v52  ;;  %v668_v13 = vsel %vm637_vm5, %v502_v27, %v667_v18  ;;  %2570 = vmatpush1.bf16.msra.mxu0 %v3915_v44  ;;  %v3954_v6 = vld [vmem:[#allocation6 + $0x8] ss:$24 sps:$4 sm:$0xff]   ;;  %v3962_v45 = vld [vmem:[#allocation6 + $0x2dc] ss:$24 sps:$4 sm:$0xff]   ;;  %v3960_v19 = vld [vmem:[#allocation6 + $0x2d8] ss:$24 sps:$4 sm:$0xff]  }
 0x19b   :  { %v718_v7 = vmul.f32 %v4829_v36, %v677_v31  ;;  %2609 = vmatpush1.bf16.msra.mxu1 %v3912_v25  ;;  %2640 = vmatprep.mubr.bf16.mxu1 %v4856_v50  ;;  %v669_v48 = vsel %vm639_vm6, %v538_v22, %v668_v13  ;;  %v3957_v5 = vld [vmem:[#allocation6 + $0x8d0] ss:$24 sps:$4 sm:$0xff]   ;;  %v3965_v59 = vld [vmem:[#allocation6 + $0x8a4] ss:$24 sps:$4 sm:$0xff]   ;;  %v3963_v42 = vld [vmem:[#allocation6 + $0x8a0] ss:$24 sps:$4 sm:$0xff]  }
 0x19c   :  { %2610 = vmatprep.subr.bf16.mxu1 %v3920_v17  ;;  %v670_v40 = vsel %vm641_vm7, %v574_v49, %v669_v48  ;;  %2571 = vmatprep.subr.bf16.mxu0 %v3923_v34  ;;  %v3968_v29 = vld [vmem:[#allocation6 + $0x2ac] ss:$24 sps:$4 sm:$0xff]   ;;  %v3966_v57 = vld [vmem:[#allocation6 + $0x2a8] ss:$24 sps:$4 sm:$0xff]   ;;  %v3974_v53 = vld [vmem:[#allocation6 + $0x27c] ss:$24 sps:$4 sm:$0xff]  }
 0x19d   :  { %v4940_v39 = vpack.c.bf16 %v718_v7, %v718_v7  ;;  %v4944_v24 = vmul.f32 %v4829_v36, %v670_v40  ;;  %v3936_v36 = vld [vmem:[#allocation6 + $0x98] ss:$24 sps:$4 sm:$0xff]   ;;  %v3971_v4 = vld [vmem:[#allocation6 + $0x874] ss:$24 sps:$4 sm:$0xff]   ;;  %v3977_v27 = vld [vmem:[#allocation6 + $0x844] ss:$24 sps:$4 sm:$0xff]  }
 0x19e   :  { %2572 = vmatpush1.bf16.msra.mxu0 %v3921_v16  ;;  %v3969_v58 = vld [vmem:[#allocation6 + $0x870] ss:$24 sps:$4 sm:$0xff]   ;;  %v3975_v28 = vld [vmem:[#allocation6 + $0x840] ss:$24 sps:$4 sm:$0xff]   ;;  %v3980_v30 = vld [vmem:[#allocation6 + $0x24c] ss:$24 sps:$4 sm:$0xff]  }
 0x19f   :  { %2599 = vmatprep.mubr.bf16.mxu0 %v4940_v39  ;;  %2611 = vmatpush1.bf16.msra.mxu1 %v3918_v23  ;;  %v3972_v43 = vld [vmem:[#allocation6 + $0x278] ss:$24 sps:$4 sm:$0xff]   ;;  %v3983_v25 = vld [vmem:[#allocation6 + $0x814] ss:$24 sps:$4 sm:$0xff]   ;;  %v3978_v32 = vld [vmem:[#allocation6 + $0x248] ss:$24 sps:$4 sm:$0xff]  }
 0x1a0   :  { %2612 = vmatprep.subr.bf16.mxu1 %v3926_v35  ;;  %2573 = vmatprep.subr.bf16.mxu0 %v3929_v63  ;;  %v3981_v22 = vld [vmem:[#allocation6 + $0x810] ss:$24 sps:$4 sm:$0xff]   ;;  %v3986_v15 = vld [vmem:[#allocation6 + $0x21c] ss:$24 sps:$4 sm:$0xff]   ;;  %v3987_v8 = vld [vmem:[#allocation6 + $0x7e0] ss:$24 sps:$4 sm:$0xff]   ;;  %v4949_v35 = vpack.c.bf16 %v4944_v24, %v4944_v24 }
 0x1a1   :  { %v3989_v54 = vld [vmem:[#allocation6 + $0x7e4] ss:$24 sps:$4 sm:$0xff]   ;;  %v3984_v12 = vld [vmem:[#allocation6 + $0x218] ss:$24 sps:$4 sm:$0xff]   ;;  %v3995_v17 = vld [vmem:[#allocation6 + $0x7b4] ss:$24 sps:$4 sm:$0xff]  }
 0x1a2   :  { %2574 = vmatpush1.bf16.msra.mxu0 %v3927_v56  ;;  %v3992_v44 = vld [vmem:[#allocation6 + $0x1ec] ss:$24 sps:$4 sm:$0xff]   ;;  %v3990_v49 = vld [vmem:[#allocation6 + $0x1e8] ss:$24 sps:$4 sm:$0xff]   ;;  %v3998_v20 = vld [vmem:[#allocation6 + $0x1bc] ss:$24 sps:$4 sm:$0xff]  }
 0x1a3   :  { %2613 = vmatpush1.bf16.msra.mxu1 %v3924_v0  ;;  %2575 = vmatprep.subr.bf16.mxu0 %v3935_v1  ;;  %v3993_v61 = vld [vmem:[#allocation6 + $0x7b0] ss:$24 sps:$4 sm:$0xff]   ;;  %v4001_v31 = vld [vmem:[#allocation6 + $0x784] ss:$24 sps:$4 sm:$0xff]   ;;  %v3999_v18 = vld [vmem:[#allocation6 + $0x780] ss:$24 sps:$4 sm:$0xff]  }
 0x1a4   :  { %2614 = vmatprep.subr.bf16.mxu1 %v3932_v55  ;;  %v3996_v34 = vld [vmem:[#allocation6 + $0x1b8] ss:$24 sps:$4 sm:$0xff]   ;;  %v4004_v7 = vld [vmem:[#allocation6 + $0x18c] ss:$24 sps:$4 sm:$0xff]   ;;  %v4007_v13 = vld [vmem:[#allocation6 + $0x45c] ss:$24 sps:$4 sm:$0xff]  }
 0x1a5   :  { %v4002_v23 = vld [vmem:[#allocation6 + $0x188] ss:$24 sps:$4 sm:$0xff]   ;;  %v4005_v48 = vld [vmem:[#allocation6 + $0x458] ss:$24 sps:$4 sm:$0xff]   ;;  %v4010_v16 = vld [vmem:[#allocation6 + $0x75c] ss:$24 sps:$4 sm:$0xff]  }
 0x1a6   :  { %2576 = vmatpush1.bf16.msra.mxu0 %v3933_v33  ;;  %v4013_v40 = vld [vmem:[#allocation6 + $0x42c] ss:$24 sps:$4 sm:$0xff]   ;;  %v4008_v63 = vld [vmem:[#allocation6 + $0x758] ss:$24 sps:$4 sm:$0xff]   ;;  %v4011_v0 = vld [vmem:[#allocation6 + $0x428] ss:$24 sps:$4 sm:$0xff]  }
 0x1a7   :  { %2615 = vmatpush1.bf16.msra.mxu1 %v3930_v11  ;;  %2577 = vmatprep.subr.bf16.mxu0 %v3941_v9  ;;  %v4016_v56 = vld [vmem:[#allocation6 + $0x72c] ss:$24 sps:$4 sm:$0xff]   ;;  %v4019_v55 = vld [vmem:[#allocation6 + $0x3fc] ss:$24 sps:$4 sm:$0xff]   ;;  %v4014_v24 = vld [vmem:[#allocation6 + $0x728] ss:$24 sps:$4 sm:$0xff]  }
 0x1a8   :  { %2616 = vmatprep.subr.bf16.mxu1 %v3938_v60  ;;  %v4017_v1 = vld [vmem:[#allocation6 + $0x3f8] ss:$24 sps:$4 sm:$0xff]   ;;  %v4022_v11 = vld [vmem:[#allocation6 + $0x6fc] ss:$24 sps:$4 sm:$0xff]   ;;  %v4025_v33 = vld [vmem:[#allocation6 + $0x3cc] ss:$24 sps:$4 sm:$0xff]  }
 0x1a9   :  { %v4020_v60 = vld [vmem:[#allocation6 + $0x6f8] ss:$24 sps:$4 sm:$0xff]   ;;  %v4023_v9 = vld [vmem:[#allocation6 + $0x3c8] ss:$24 sps:$4 sm:$0xff]  }
 0x1aa   :  { %2578 = vmatpush1.bf16.msra.mxu0 %v3939_v2  ;;  %v4031_v2 = vld [vmem:[#allocation6 + $0x39c] ss:$24 sps:$4 sm:$0xff]  }
 0x1ab   :  { %2617 = vmatpush1.bf16.msra.mxu1 %v3936_v36  ;;  %2579 = vmatprep.subr.bf16.mxu0 %v3947_v41  ;;  %v4028_v36 = vld [vmem:[#allocation6 + $0x6cc] ss:$24 sps:$4 sm:$0xff]   ;;  %v4029_v41 = vld [vmem:[#allocation6 + $0x398] ss:$24 sps:$4 sm:$0xff]  }
 0x1ac   :  { %2618 = vmatprep.subr.bf16.mxu1 %v3944_v10  ;;  %v4026_v10 = vld [vmem:[#allocation6 + $0x6c8] ss:$24 sps:$4 sm:$0xff]  }
 0x1ae   :  { %2580 = vmatpush1.bf16.msra.mxu0 %v3945_v26  ;;  %v4037_v26 = vld [vmem:[#allocation6 + $0x36c] ss:$24 sps:$4 sm:$0xff]  }
 0x1af   :  { %2619 = vmatpush1.bf16.msra.mxu1 %v3942_v37  ;;  %2581 = vmatprep.subr.bf16.mxu0 %v3953_v3  ;;  %v4034_v37 = vld [vmem:[#allocation6 + $0x69c] ss:$24 sps:$4 sm:$0xff]   ;;  %v4035_v3 = vld [vmem:[#allocation6 + $0x368] ss:$24 sps:$4 sm:$0xff]  }
 0x1b0   :  { %2620 = vmatprep.subr.bf16.mxu1 %v3950_v62  ;;  %v4032_v62 = vld [vmem:[#allocation6 + $0x698] ss:$24 sps:$4 sm:$0xff]  }
 0x1b2   :  { %2582 = vmatpush1.bf16.msra.mxu0 %v3951_v46  ;;  %v4043_v46 = vld [vmem:[#allocation6 + $0x33c] ss:$24 sps:$4 sm:$0xff]  }
 0x1b3   :  { %2621 = vmatpush1.bf16.msra.mxu1 %v3948_v14  ;;  %2583 = vmatprep.subr.bf16.mxu0 %v3959_v47  ;;  %v4040_v14 = vld [vmem:[#allocation6 + $0x66c] ss:$24 sps:$4 sm:$0xff]   ;;  %v4041_v47 = vld [vmem:[#allocation6 + $0x338] ss:$24 sps:$4 sm:$0xff]  }
 0x1b4   :  { %2622 = vmatprep.subr.bf16.mxu1 %v3956_v51  ;;  %v4038_v51 = vld [vmem:[#allocation6 + $0x668] ss:$24 sps:$4 sm:$0xff]  }
 0x1b6   :  { %2584 = vmatpush2.bf16.msra.mxu0 %v3957_v5  ;;  %v4049_v5 = vld [vmem:[#allocation6 + $0x30c] ss:$24 sps:$4 sm:$0xff]  }
 0x1b7   :  { %2623 = vmatpush1.bf16.msra.mxu1 %v3954_v6  ;;  %2585 = vmatprep.subr.bf16.mxu0 %v3965_v59  ;;  %v4046_v6 = vld [vmem:[#allocation6 + $0x63c] ss:$24 sps:$4 sm:$0xff]   ;;  %v4047_v59 = vld [vmem:[#allocation6 + $0x308] ss:$24 sps:$4 sm:$0xff]  }
 0x1b8   :  { %2624 = vmatprep.subr.bf16.mxu1 %v3962_v45  ;;  %v4044_v45 = vld [vmem:[#allocation6 + $0x638] ss:$24 sps:$4 sm:$0xff]  }
 0x1ba   :  { %2586 = vmatpush2.bf16.msra.mxu0 %v3963_v42  ;;  %v4055_v42 = vld [vmem:[#allocation6 + $0x5dc] ss:$24 sps:$4 sm:$0xff]  }
 0x1bb   :  { %2625 = vmatpush2.bf16.msra.mxu1 %v3960_v19  ;;  %2587 = vmatprep.subr.bf16.mxu0 %v3971_v4  ;;  %v4052_v19 = vld [vmem:[#allocation6 + $0x60c] ss:$24 sps:$4 sm:$0xff]   ;;  %v4053_v4 = vld [vmem:[#allocation6 + $0x5d8] ss:$24 sps:$4 sm:$0xff]  }
 0x1bc   :  { %2626 = vmatprep.subr.bf16.mxu1 %v3968_v29  ;;  %v4050_v29 = vld [vmem:[#allocation6 + $0x608] ss:$24 sps:$4 sm:$0xff]  }
 0x1be   :  { %2588 = vmatpush2.bf16.msra.mxu0 %v3969_v58  ;;  %v4061_v58 = vld [vmem:[#allocation6 + $0x5ac] ss:$24 sps:$4 sm:$0xff]  }
 0x1bf   :  { %2627 = vmatpush2.bf16.msra.mxu1 %v3966_v57  ;;  %2589 = vmatprep.subr.bf16.mxu0 %v3977_v27  ;;  %v4058_v57 = vld [vmem:[#allocation6 + $0x8dc] ss:$24 sps:$4 sm:$0xff]   ;;  %v4059_v27 = vld [vmem:[#allocation6 + $0x5a8] ss:$24 sps:$4 sm:$0xff]  }
 0x1c0   :  { %2628 = vmatprep.subr.bf16.mxu1 %v3974_v53  ;;  %v4056_v53 = vld [vmem:[#allocation6 + $0x8d8] ss:$24 sps:$4 sm:$0xff]  }
 0x1c2   :  { %2590 = vmatpush2.bf16.msra.mxu0 %v3975_v28  ;;  %v4067_v28 = vld [vmem:[#allocation6 + $0x57c] ss:$24 sps:$4 sm:$0xff]  }
 0x1c3   :  { %2629 = vmatpush2.bf16.msra.mxu1 %v3972_v43  ;;  %2591 = vmatprep.subr.bf16.mxu0 %v3983_v25  ;;  %v4064_v43 = vld [vmem:[#allocation6 + $0x8ac] ss:$24 sps:$4 sm:$0xff]   ;;  %v4065_v25 = vld [vmem:[#allocation6 + $0x578] ss:$24 sps:$4 sm:$0xff]  }
 0x1c4   :  { %2630 = vmatprep.subr.bf16.mxu1 %v3980_v30  ;;  %v4062_v30 = vld [vmem:[#allocation6 + $0x8a8] ss:$24 sps:$4 sm:$0xff]  }
 0x1c6   :  { %2592 = vmatpush2.bf16.msra.mxu0 %v3981_v22  ;;  %v4073_v22 = vld [vmem:[#allocation6 + $0x54c] ss:$24 sps:$4 sm:$0xff]  }
 0x1c7   :  { %2631 = vmatpush2.bf16.msra.mxu1 %v3978_v32  ;;  %2593 = vmatprep.subr.bf16.mxu0 %v3989_v54  ;;  %v4070_v32 = vld [vmem:[#allocation6 + $0x87c] ss:$24 sps:$4 sm:$0xff]   ;;  %v4071_v54 = vld [vmem:[#allocation6 + $0x548] ss:$24 sps:$4 sm:$0xff]  }
 0x1c8   :  { %2632 = vmatprep.subr.bf16.mxu1 %v3986_v15  ;;  %v4068_v15 = vld [vmem:[#allocation6 + $0x878] ss:$24 sps:$4 sm:$0xff]  }
 0x1ca   :  { %2594 = vmatpush2.bf16.msra.mxu0 %v3987_v8  ;;  %v4079_v8 = vld [vmem:[#allocation6 + $0x51c] ss:$24 sps:$4 sm:$0xff]  }
 0x1cb   :  { %2633 = vmatpush2.bf16.msra.mxu1 %v3984_v12  ;;  %2595 = vmatprep.subr.bf16.mxu0 %v3995_v17  ;;  %v4076_v12 = vld [vmem:[#allocation6 + $0x84c] ss:$24 sps:$4 sm:$0xff]   ;;  %v4077_v17 = vld [vmem:[#allocation6 + $0x518] ss:$24 sps:$4 sm:$0xff]  }
 0x1cc   :  { %2634 = vmatprep.subr.bf16.mxu1 %v3992_v44  ;;  %v4074_v44 = vld [vmem:[#allocation6 + $0x848] ss:$24 sps:$4 sm:$0xff]  }
 0x1ce   :  { %2596 = vmatpush2.bf16.msra.mxu0 %v3993_v61  ;;  %v4085_v61 = vld [vmem:[#allocation6 + $0x4ec] ss:$24 sps:$4 sm:$0xff]  }
 0x1cf   :  { %2635 = vmatpush2.bf16.msra.mxu1 %v3990_v49  ;;  %2597 = vmatprep.subr.bf16.mxu0 %v4001_v31  ;;  %v4082_v49 = vld [vmem:[#allocation6 + $0x81c] ss:$24 sps:$4 sm:$0xff]   ;;  %v4083_v31 = vld [vmem:[#allocation6 + $0x4e8] ss:$24 sps:$4 sm:$0xff]  }
 0x1d0   :  { %2636 = vmatprep.subr.bf16.mxu1 %v3998_v20  ;;  %v4080_v20 = vld [vmem:[#allocation6 + $0x818] ss:$24 sps:$4 sm:$0xff]  }
 0x1d2   :  { %2598 = vmatpush2.bf16.msra.mxu0 %v3999_v18  ;;  %v4091_v18 = vld [vmem:[#allocation6 + $0x4bc] ss:$24 sps:$4 sm:$0xff]  }
 0x1d3   :  { %2637 = vmatpush2.bf16.msra.mxu1 %v3996_v34  ;;  %2649 = vmatprep.subr.bf16.mxu0 %v4007_v13  ;;  %v4088_v34 = vld [vmem:[#allocation6 + $0x7ec] ss:$24 sps:$4 sm:$0xff]   ;;  %v4089_v13 = vld [vmem:[#allocation6 + $0x4b8] ss:$24 sps:$4 sm:$0xff]  }
 0x1d4   :  { %2638 = vmatprep.subr.bf16.mxu1 %v4004_v7  ;;  %v4086_v7 = vld [vmem:[#allocation6 + $0x7e8] ss:$24 sps:$4 sm:$0xff]  }
 0x1d5   :  { %2600 = vmatmul.mubr.bf16.vlgmr.msra.gmra.mxu0 %v4949_v35 }
 0x1d6   :  { %2650 = vmatpush1.bf16.msra.mxu0 %v4005_v48  ;;  %2681 = vmatprep.mubr.bf16.mxu0 %v4870_v21  ;;  %v4097_v48 = vld [vmem:[#allocation6 + $0x48c] ss:$24 sps:$4 sm:$0xff]  }
 0x1d7   :  { %2639 = vmatpush2.bf16.msra.mxu1 %v4002_v23  ;;  %2651 = vmatprep.subr.bf16.mxu0 %v4013_v40  ;;  %v4094_v23 = vld [vmem:[#allocation6 + $0x7bc] ss:$24 sps:$4 sm:$0xff]   ;;  %v4095_v40 = vld [vmem:[#allocation6 + $0x488] ss:$24 sps:$4 sm:$0xff]  }
 0x1d8   :  { %2690 = vmatprep.subr.bf16.mxu1 %v4010_v16  ;;  %v4092_v16 = vld [vmem:[#allocation6 + $0x7b8] ss:$24 sps:$4 sm:$0xff]  }
 0x1da   :  { %2641 = vmatmul.mubr.bf16.vlgmr.msra.gmra.mxu1 %v4903_v38  ;;  %2652 = vmatpush1.bf16.msra.mxu0 %v4011_v0  ;;  %v4103_v0 = vld [vmem:[#allocation6 + $0x164] ss:$24 sps:$4 sm:$0xff]  }
 0x1db   :  { %2691 = vmatpush1.bf16.msra.mxu1 %v4008_v63  ;;  %2722 = vmatprep.mubr.bf16.mxu1 %v4940_v39  ;;  %v4100_v63 = vld [vmem:[#allocation6 + $0x78c] ss:$24 sps:$4 sm:$0xff]  }
 0x1dc   :  { %2692 = vmatprep.subr.bf16.mxu1 %v4016_v56  ;;  %2653 = vmatprep.subr.bf16.mxu0 %v4019_v55  ;;  %v4098_v56 = vld [vmem:[#allocation6 + $0x788] ss:$24 sps:$4 sm:$0xff]  }
 0x1dd   :  { %v4101_v55 = vld [vmem:[#allocation6 + $0x160] ss:$24 sps:$4 sm:$0xff]  }
 0x1de   :  { %2654 = vmatpush1.bf16.msra.mxu0 %v4017_v1  ;;  %v4109_v1 = vld [vmem:[#allocation6 + $0x134] ss:$24 sps:$4 sm:$0xff]  }
 0x1df   :  { %2693 = vmatpush1.bf16.msra.mxu1 %v4014_v24  ;;  %2655 = vmatprep.subr.bf16.mxu0 %v4025_v33  ;;  %v4106_v24 = vld [vmem:[#allocation6 + $0x464] ss:$24 sps:$4 sm:$0xff]   ;;  %v4107_v33 = vld [vmem:[#allocation6 + $0x130] ss:$24 sps:$4 sm:$0xff]  }
 0x1e0   :  { %2694 = vmatprep.subr.bf16.mxu1 %v4022_v11  ;;  %v4104_v11 = vld [vmem:[#allocation6 + $0x460] ss:$24 sps:$4 sm:$0xff]  }
 0x1e2   :  { %2656 = vmatpush1.bf16.msra.mxu0 %v4023_v9  ;;  %v4115_v9 = vld [vmem:[#allocation6 + $0x104] ss:$24 sps:$4 sm:$0xff]  }
 0x1e3   :  { %2695 = vmatpush1.bf16.msra.mxu1 %v4020_v60  ;;  %2657 = vmatprep.subr.bf16.mxu0 %v4031_v2  ;;  %v4112_v60 = vld [vmem:[#allocation6 + $0x434] ss:$24 sps:$4 sm:$0xff]   ;;  %v4113_v2 = vld [vmem:[#allocation6 + $0x100] ss:$24 sps:$4 sm:$0xff]  }
 0x1e4   :  { %2696 = vmatprep.subr.bf16.mxu1 %v4028_v36  ;;  %v4110_v36 = vld [vmem:[#allocation6 + $0x430] ss:$24 sps:$4 sm:$0xff]  }
 0x1e6   :  { %2658 = vmatpush1.bf16.msra.mxu0 %v4029_v41  ;;  %v4121_v41 = vld [vmem:[#allocation6 + $0xd4] ss:$24 sps:$4 sm:$0xff]  }
 0x1e7   :  { %2697 = vmatpush1.bf16.msra.mxu1 %v4026_v10  ;;  %2659 = vmatprep.subr.bf16.mxu0 %v4037_v26  ;;  %v4118_v10 = vld [vmem:[#allocation6 + $0x404] ss:$24 sps:$4 sm:$0xff]   ;;  %v4119_v26 = vld [vmem:[#allocation6 + $0xd0] ss:$24 sps:$4 sm:$0xff]  }
 0x1e8   :  { %2698 = vmatprep.subr.bf16.mxu1 %v4034_v37  ;;  %v4116_v37 = vld [vmem:[#allocation6 + $0x400] ss:$24 sps:$4 sm:$0xff]  }
 0x1ea   :  { %2660 = vmatpush1.bf16.msra.mxu0 %v4035_v3  ;;  %v4122_v3 = vld [vmem:[#allocation6 + $0x3d0] ss:$24 sps:$4 sm:$0xff]  }
 0x1eb   :  { %2699 = vmatpush1.bf16.msra.mxu1 %v4032_v62  ;;  %2661 = vmatprep.subr.bf16.mxu0 %v4043_v46  ;;  %v4127_v62 = vld [vmem:[#allocation6 + $0xa4] ss:$24 sps:$4 sm:$0xff]   ;;  %v4133_v46 = vld [vmem:[#allocation6 + $0x74] ss:$24 sps:$4 sm:$0xff]  }
 0x1ec   :  { %2700 = vmatprep.subr.bf16.mxu1 %v4040_v14  ;;  %v4130_v14 = vld [vmem:[#allocation6 + $0x3a4] ss:$24 sps:$4 sm:$0xff]  }
 0x1ee   :  { %2662 = vmatpush1.bf16.msra.mxu0 %v4041_v47  ;;  %v4131_v47 = vld [vmem:[#allocation6 + $0x70] ss:$24 sps:$4 sm:$0xff]  }
 0x1ef   :  { %2701 = vmatpush1.bf16.msra.mxu1 %v4038_v51  ;;  %2663 = vmatprep.subr.bf16.mxu0 %v4049_v5  ;;  %v4128_v51 = vld [vmem:[#allocation6 + $0x3a0] ss:$24 sps:$4 sm:$0xff]   ;;  %v4139_v5 = vld [vmem:[#allocation6 + $0x44] ss:$24 sps:$4 sm:$0xff]  }
 0x1f0   :  { %2702 = vmatprep.subr.bf16.mxu1 %v4046_v6  ;;  %v4136_v6 = vld [vmem:[#allocation6 + $0x374] ss:$24 sps:$4 sm:$0xff]  }
 0x1f2   :  { %2664 = vmatpush1.bf16.msra.mxu0 %v4047_v59  ;;  %v4137_v59 = vld [vmem:[#allocation6 + $0x40] ss:$24 sps:$4 sm:$0xff]  }
 0x1f3   :  { %2703 = vmatpush1.bf16.msra.mxu1 %v4044_v45  ;;  %2665 = vmatprep.subr.bf16.mxu0 %v4055_v42  ;;  %v4134_v45 = vld [vmem:[#allocation6 + $0x370] ss:$24 sps:$4 sm:$0xff]   ;;  %v4145_v42 = vld [vmem:[#allocation6 + $0x14] ss:$24 sps:$4 sm:$0xff]  }
 0x1f4   :  { %2704 = vmatprep.subr.bf16.mxu1 %v4052_v19  ;;  %v4142_v19 = vld [vmem:[#allocation6 + $0x344] ss:$24 sps:$4 sm:$0xff]  }
 0x1f6   :  { %2666 = vmatpush2.bf16.msra.mxu0 %v4053_v4  ;;  %v4143_v4 = vld [vmem:[#allocation6 + $0x10] ss:$24 sps:$4 sm:$0xff]  }
 0x1f7   :  { %2705 = vmatpush1.bf16.msra.mxu1 %v4050_v29  ;;  %2667 = vmatprep.subr.bf16.mxu0 %v4061_v58  ;;  %v4140_v29 = vld [vmem:[#allocation6 + $0x340] ss:$24 sps:$4 sm:$0xff]   ;;  %v4151_v58 = vld [vmem:[#allocation6 + $0x2e4] ss:$24 sps:$4 sm:$0xff]  }
 0x1f8   :  { %2706 = vmatprep.subr.bf16.mxu1 %v4058_v57  ;;  %v4148_v57 = vld [vmem:[#allocation6 + $0x314] ss:$24 sps:$4 sm:$0xff]  }
 0x1fa   :  { %2668 = vmatpush2.bf16.msra.mxu0 %v4059_v27  ;;  %v4149_v27 = vld [vmem:[#allocation6 + $0x2e0] ss:$24 sps:$4 sm:$0xff]  }
 0x1fb   :  { %2707 = vmatpush2.bf16.msra.mxu1 %v4056_v53  ;;  %2669 = vmatprep.subr.bf16.mxu0 %v4067_v28  ;;  %v4146_v53 = vld [vmem:[#allocation6 + $0x310] ss:$24 sps:$4 sm:$0xff]   ;;  %v4157_v28 = vld [vmem:[#allocation6 + $0x2b4] ss:$24 sps:$4 sm:$0xff]  }
 0x1fc   :  { %2708 = vmatprep.subr.bf16.mxu1 %v4064_v43  ;;  %v4154_v43 = vld [vmem:[#allocation6 + $0x5e4] ss:$24 sps:$4 sm:$0xff]  }
 0x1fe   :  { %2670 = vmatpush2.bf16.msra.mxu0 %v4065_v25  ;;  %v4155_v25 = vld [vmem:[#allocation6 + $0x2b0] ss:$24 sps:$4 sm:$0xff]  }
 0x1ff   :  { %2709 = vmatpush2.bf16.msra.mxu1 %v4062_v30  ;;  %2671 = vmatprep.subr.bf16.mxu0 %v4073_v22  ;;  %v4152_v30 = vld [vmem:[#allocation6 + $0x5e0] ss:$24 sps:$4 sm:$0xff]   ;;  %v4163_v22 = vld [vmem:[#allocation6 + $0x284] ss:$24 sps:$4 sm:$0xff]  }
 0x200   :  { %2710 = vmatprep.subr.bf16.mxu1 %v4070_v32  ;;  %v4160_v32 = vld [vmem:[#allocation6 + $0x5b4] ss:$24 sps:$4 sm:$0xff]  }
 0x202   :  { %2672 = vmatpush2.bf16.msra.mxu0 %v4071_v54  ;;  %v4161_v54 = vld [vmem:[#allocation6 + $0x280] ss:$24 sps:$4 sm:$0xff]  }
 0x203   :  { %2711 = vmatpush2.bf16.msra.mxu1 %v4068_v15  ;;  %2673 = vmatprep.subr.bf16.mxu0 %v4079_v8  ;;  %v4158_v15 = vld [vmem:[#allocation6 + $0x5b0] ss:$24 sps:$4 sm:$0xff]   ;;  %v4169_v8 = vld [vmem:[#allocation6 + $0x254] ss:$24 sps:$4 sm:$0xff]  }
 0x204   :  { %2712 = vmatprep.subr.bf16.mxu1 %v4076_v12  ;;  %v4166_v12 = vld [vmem:[#allocation6 + $0x584] ss:$24 sps:$4 sm:$0xff]  }
 0x206   :  { %2674 = vmatpush2.bf16.msra.mxu0 %v4077_v17  ;;  %v4167_v17 = vld [vmem:[#allocation6 + $0x250] ss:$24 sps:$4 sm:$0xff]  }
 0x207   :  { %2713 = vmatpush2.bf16.msra.mxu1 %v4074_v44  ;;  %2675 = vmatprep.subr.bf16.mxu0 %v4085_v61  ;;  %v4164_v44 = vld [vmem:[#allocation6 + $0x580] ss:$24 sps:$4 sm:$0xff]   ;;  %v4175_v61 = vld [vmem:[#allocation6 + $0x224] ss:$24 sps:$4 sm:$0xff]  }
 0x208   :  { %2714 = vmatprep.subr.bf16.mxu1 %v4082_v49  ;;  %v4172_v49 = vld [vmem:[#allocation6 + $0x554] ss:$24 sps:$4 sm:$0xff]  }
 0x20a   :  { %2676 = vmatpush2.bf16.msra.mxu0 %v4083_v31  ;;  %v4173_v31 = vld [vmem:[#allocation6 + $0x220] ss:$24 sps:$4 sm:$0xff]  }
 0x20b   :  { %2715 = vmatpush2.bf16.msra.mxu1 %v4080_v20  ;;  %2677 = vmatprep.subr.bf16.mxu0 %v4091_v18  ;;  %v4170_v20 = vld [vmem:[#allocation6 + $0x550] ss:$24 sps:$4 sm:$0xff]   ;;  %v4181_v18 = vld [vmem:[#allocation6 + $0x1f4] ss:$24 sps:$4 sm:$0xff]  }
 0x20c   :  { %2716 = vmatprep.subr.bf16.mxu1 %v4088_v34  ;;  %v4178_v34 = vld [vmem:[#allocation6 + $0x524] ss:$24 sps:$4 sm:$0xff]  }
 0x20e   :  { %2678 = vmatpush2.bf16.msra.mxu0 %v4089_v13  ;;  %v4179_v13 = vld [vmem:[#allocation6 + $0x1f0] ss:$24 sps:$4 sm:$0xff]  }
 0x20f   :  { %2717 = vmatpush2.bf16.msra.mxu1 %v4086_v7  ;;  %2679 = vmatprep.subr.bf16.mxu0 %v4097_v48  ;;  %v4176_v7 = vld [vmem:[#allocation6 + $0x520] ss:$24 sps:$4 sm:$0xff]   ;;  %v4187_v48 = vld [vmem:[#allocation6 + $0x1c4] ss:$24 sps:$4 sm:$0xff]  }
 0x210   :  { %2718 = vmatprep.subr.bf16.mxu1 %v4094_v23  ;;  %v4184_v23 = vld [vmem:[#allocation6 + $0x4f4] ss:$24 sps:$4 sm:$0xff]  }
 0x212   :  { %2680 = vmatpush2.bf16.msra.mxu0 %v4095_v40  ;;  %v4185_v40 = vld [vmem:[#allocation6 + $0x1c0] ss:$24 sps:$4 sm:$0xff]  }
 0x213   :  { %2719 = vmatpush2.bf16.msra.mxu1 %v4092_v16  ;;  %2731 = vmatprep.subr.bf16.mxu0 %v4103_v0  ;;  %v4182_v16 = vld [vmem:[#allocation6 + $0x4f0] ss:$24 sps:$4 sm:$0xff]   ;;  %v4193_v0 = vld [vmem:[#allocation6 + $0x194] ss:$24 sps:$4 sm:$0xff]  }
 0x214   :  { %2720 = vmatprep.subr.bf16.mxu1 %v4100_v63  ;;  %v4190_v63 = vld [vmem:[#allocation6 + $0x4c4] ss:$24 sps:$4 sm:$0xff]  }
 0x215   :  { %2682 = vmatmul.mubr.bf16.vlgmr.msra.gmra.mxu0 %v4925_v52 }
 0x216   :  { %2732 = vmatpush1.bf16.msra.mxu0 %v4101_v55  ;;  %2763 = vmatprep.mubr.bf16.mxu0 %v4856_v50  ;;  %v4124_v50 = vld [vmem:[#allocation6 + $0x3d4] ss:$24 sps:$4 sm:$0xff]   ;;  %v4191_v55 = vld [vmem:[#allocation6 + $0x190] ss:$24 sps:$4 sm:$0xff]  }
 0x217   :  { %2721 = vmatpush2.bf16.msra.mxu1 %v4098_v56  ;;  %2733 = vmatprep.subr.bf16.mxu0 %v4109_v1  ;;  %v4188_v56 = vld [vmem:[#allocation6 + $0x4c0] ss:$24 sps:$4 sm:$0xff]   ;;  %v4199_v1 = vld [vmem:[#allocation6 + $0x764] ss:$24 sps:$4 sm:$0xff]  }
 0x218   :  { %2772 = vmatprep.subr.bf16.mxu1 %v4106_v24  ;;  %v4196_v24 = vld [vmem:[#allocation6 + $0x494] ss:$24 sps:$4 sm:$0xff]  }
 0x21a   :  { %2723 = vmatmul.mubr.bf16.vlgmr.msra.gmra.mxu1 %v4949_v35  ;;  %2734 = vmatpush1.bf16.msra.mxu0 %v4107_v33  ;;  %v4197_v33 = vld [vmem:[#allocation6 + $0x760] ss:$24 sps:$4 sm:$0xff]  }
 0x21b   :  { %2773 = vmatpush1.bf16.msra.mxu1 %v4104_v11  ;;  %2804 = vmatprep.mubr.bf16.mxu1 %v4870_v21  ;;  %v4125_v21 = vld [vmem:[#allocation6 + $0xa0] ss:$24 sps:$4 sm:$0xff]   ;;  %v4194_v11 = vld [vmem:[#allocation6 + $0x490] ss:$24 sps:$4 sm:$0xff]  }
 0x21c   :  { %2774 = vmatprep.subr.bf16.mxu1 %v4112_v60  ;;  %2735 = vmatprep.subr.bf16.mxu0 %v4115_v9  ;;  %v4202_v60 = vld [vmem:[#allocation6 + $0x734] ss:$24 sps:$4 sm:$0xff]   ;;  %v4239_v9 = vld [vmem:[#allocation9 + $0x78] sm:$0xff]  }
 0x21e   :  { %2736 = vmatpush1.bf16.msra.mxu0 %v4113_v2  ;;  %v4240_v2 = vld [vmem:[#allocation9 + $0x38] sm:$0xff]  }
 0x21f   :  { %2775 = vmatpush1.bf16.msra.mxu1 %v4110_v36  ;;  %2737 = vmatprep.subr.bf16.mxu0 %v4121_v41  ;;  %v4200_v41 = vld [vmem:[#allocation6 + $0x730] ss:$24 sps:$4 sm:$0xff]  }
 0x220   :  { %2776 = vmatprep.subr.bf16.mxu1 %v4118_v10 }
 0x222   :  { %2738 = vmatpush1.bf16.msra.mxu0 %v4119_v26  ;;  %v4205_v26 = vld [vmem:[#allocation6 + $0x704] ss:$24 sps:$4 sm:$0xff]  }
 0x223   :  { %2777 = vmatpush1.bf16.msra.mxu1 %v4116_v37  ;;  %2739 = vmatprep.subr.bf16.mxu0 %v4127_v62  ;;  %v4244_v37 = vld [vmem:[#allocation9 + $0x70] sm:$0xff]  }
 0x224   :  { %2778 = vmatprep.subr.bf16.mxu1 %v4124_v50 }
 0x226   :  { %2740 = vmatpush1.bf16.msra.mxu0 %v4125_v21 }
 0x227   :  { %2779 = vmatpush1.bf16.msra.mxu1 %v4122_v3  ;;  %2741 = vmatprep.subr.bf16.mxu0 %v4133_v46  ;;  %v4245_v3 = vld [vmem:[#allocation9 + $0x30] sm:$0xff]  }
 0x228   :  { %2780 = vmatprep.subr.bf16.mxu1 %v4130_v14  ;;  %v4203_v14 = vld [vmem:[#allocation6 + $0x700] ss:$24 sps:$4 sm:$0xff]   ;;  %v4208_v46 = vld [vmem:[#allocation6 + $0x6d4] ss:$24 sps:$4 sm:$0xff]  }
 0x22a   :  { %2742 = vmatpush1.bf16.msra.mxu0 %v4131_v47  ;;  %v4250_v47 = vld [vmem:[#allocation9 + $0x28] sm:$0xff]  }
 0x22b   :  { %2781 = vmatpush1.bf16.msra.mxu1 %v4128_v51  ;;  %2743 = vmatprep.subr.bf16.mxu0 %v4139_v5  ;;  %v4251_v5 = vld [vmem:[#allocation9 + $0x60] sm:$0xff]  }
 0x22c   :  { %2782 = vmatprep.subr.bf16.mxu1 %v4136_v6 }
 0x22e   :  { %2744 = vmatpush1.bf16.msra.mxu0 %v4137_v59  ;;  %v4252_v59 = vld [vmem:[#allocation9 + $0x20] sm:$0xff]  }
 0x22f   :  { %2783 = vmatpush1.bf16.msra.mxu1 %v4134_v45  ;;  %2745 = vmatprep.subr.bf16.mxu0 %v4145_v42  ;;  %v4211_v45 = vld [vmem:[#allocation6 + $0x6a4] ss:$24 sps:$4 sm:$0xff]  }
 0x230   :  { %2784 = vmatprep.subr.bf16.mxu1 %v4142_v19  ;;  %v4209_v19 = vld [vmem:[#allocation6 + $0x6a0] ss:$24 sps:$4 sm:$0xff]  }
 0x231   :  { %v4253_v42 = vld [vmem:[#allocation9 + $0x58] sm:$0xff]  }
 0x232   :  { %2746 = vmatpush1.bf16.msra.mxu0 %v4143_v4  ;;  %v4254_v4 = vld [vmem:[#allocation9 + $0x18] sm:$0xff]  }
 0x233   :  { %2785 = vmatpush1.bf16.msra.mxu1 %v4140_v29  ;;  %2747 = vmatprep.subr.bf16.mxu0 %v4151_v58  ;;  %v4214_v29 = vld [vmem:[#allocation6 + $0x674] ss:$24 sps:$4 sm:$0xff]  }
 0x234   :  { %2786 = vmatprep.subr.bf16.mxu1 %v4148_v57  ;;  %v4212_v57 = vld [vmem:[#allocation6 + $0x670] ss:$24 sps:$4 sm:$0xff]   ;;  %v4255_v58 = vld [vmem:[#allocation9 + $0x50] sm:$0xff]  }
 0x236   :  { %2748 = vmatpush2.bf16.msra.mxu0 %v4149_v27  ;;  %v4256_v27 = vld [vmem:[#allocation9 + $0x10] sm:$0xff]  }
 0x237   :  { %2787 = vmatpush1.bf16.msra.mxu1 %v4146_v53  ;;  %2749 = vmatprep.subr.bf16.mxu0 %v4157_v28  ;;  %v4217_v53 = vld [vmem:[#allocation6 + $0x644] ss:$24 sps:$4 sm:$0xff]   ;;  %v4257_v28 = vld [vmem:[#allocation9 + $0x48] sm:$0xff]  }
 0x238   :  { %2788 = vmatprep.subr.bf16.mxu1 %v4154_v43  ;;  %v4215_v43 = vld [vmem:[#allocation6 + $0x640] ss:$24 sps:$4 sm:$0xff]  }
 0x23a   :  { %2750 = vmatpush2.bf16.msra.mxu0 %v4155_v25  ;;  %v4258_v25 = vld [vmem:[#allocation9 + $0x8] sm:$0xff]  }
 0x23b   :  { %2789 = vmatpush2.bf16.msra.mxu1 %v4152_v30  ;;  %2751 = vmatprep.subr.bf16.mxu0 %v4163_v22  ;;  %v4220_v30 = vld [vmem:[#allocation6 + $0x614] ss:$24 sps:$4 sm:$0xff]  }
 0x23c   :  { %2790 = vmatprep.subr.bf16.mxu1 %v4160_v32  ;;  %v4218_v32 = vld [vmem:[#allocation6 + $0x610] ss:$24 sps:$4 sm:$0xff]  }
 0x23d   :  { %v4259_v22 = vld [vmem:[#allocation9 + $0x40] sm:$0xff]  }
 0x23e   :  { %2752 = vmatpush2.bf16.msra.mxu0 %v4161_v54  ;;  %v4260_v54 = vld [vmem:[#allocation9] sm:$0xff]  }
 0x23f   :  { %2791 = vmatpush2.bf16.msra.mxu1 %v4158_v15  ;;  %2753 = vmatprep.subr.bf16.mxu0 %v4169_v8  ;;  %v4223_v15 = vld [vmem:[#allocation6 + $0x8e4] ss:$24 sps:$4 sm:$0xff]  }
 0x240   :  { %2792 = vmatprep.subr.bf16.mxu1 %v4166_v12  ;;  %v4221_v12 = vld [vmem:[#allocation6 + $0x8e0] ss:$24 sps:$4 sm:$0xff]  }
 0x241   :  { %v4261_v8 = vld [vmem:[#allocation9 + $0xf8] sm:$0xff]  }
 0x242   :  { %2754 = vmatpush2.bf16.msra.mxu0 %v4167_v17  ;;  %v4224_v17 = vld [vmem:[#allocation6 + $0x8b0] ss:$24 sps:$4 sm:$0xff]  }
 0x243   :  { %2793 = vmatpush2.bf16.msra.mxu1 %v4164_v44  ;;  %2755 = vmatprep.subr.bf16.mxu0 %v4175_v61  ;;  %v4226_v44 = vld [vmem:[#allocation6 + $0x8b4] ss:$24 sps:$4 sm:$0xff]   ;;  %v4227_v61 = vld [vmem:[#allocation6 + $0x880] ss:$24 sps:$4 sm:$0xff]  }
 0x244   :  { %2794 = vmatprep.subr.bf16.mxu1 %v4172_v49  ;;  %v4229_v49 = vld [vmem:[#allocation6 + $0x884] ss:$24 sps:$4 sm:$0xff]  }
 0x246   :  { %2756 = vmatpush2.bf16.msra.mxu0 %v4173_v31  ;;  %v4230_v31 = vld [vmem:[#allocation6 + $0x850] ss:$24 sps:$4 sm:$0xff]  }
 0x247   :  { %2795 = vmatpush2.bf16.msra.mxu1 %v4170_v20  ;;  %2757 = vmatprep.subr.bf16.mxu0 %v4181_v18  ;;  %v4232_v20 = vld [vmem:[#allocation6 + $0x854] ss:$24 sps:$4 sm:$0xff]   ;;  %v4233_v18 = vld [vmem:[#allocation6 + $0x820] ss:$24 sps:$4 sm:$0xff]  }
 0x248   :  { %2796 = vmatprep.subr.bf16.mxu1 %v4178_v34  ;;  %v4235_v34 = vld [vmem:[#allocation6 + $0x824] ss:$24 sps:$4 sm:$0xff]  }
 0x24a   :  { %2758 = vmatpush2.bf16.msra.mxu0 %v4179_v13  ;;  %v4236_v13 = vld [vmem:[#allocation6 + $0x7f0] ss:$24 sps:$4 sm:$0xff]  }
 0x24b   :  { %2797 = vmatpush2.bf16.msra.mxu1 %v4176_v7  ;;  %2759 = vmatprep.subr.bf16.mxu0 %v4187_v48  ;;  %v4238_v7 = vld [vmem:[#allocation6 + $0x7f4] ss:$24 sps:$4 sm:$0xff]   ;;  %v4970_v48 = vld [vmem:[#allocation8] sm:$0x3f] }
 0x24c   :  { %2798 = vmatprep.subr.bf16.mxu1 %v4184_v23  ;;  %v4243_v23 = vld [vmem:[#allocation6 + $0x7c4] ss:$24 sps:$4 sm:$0xff]  }
 0x24e   :  { %2760 = vmatpush2.bf16.msra.mxu0 %v4185_v40  ;;  %v4248_v40 = vld [vmem:[#allocation6 + $0x794] ss:$24 sps:$4 sm:$0xff]  }
 0x24f   :  { %2799 = vmatpush2.bf16.msra.mxu1 %v4182_v16  ;;  %2761 = vmatprep.subr.bf16.mxu0 %v4193_v0  ;;  %v4241_v16 = vld [vmem:[#allocation6 + $0x7c0] ss:$24 sps:$4 sm:$0xff]  }
 0x250   :  { %2800 = vmatprep.subr.bf16.mxu1 %v4190_v63  ;;  %v5069_v63 = vld [vmem:[#allocation17_spill] sm:$0xff] }
 0x251   :  { %v5070_v0 = vsub.s32 0, %v5069_v63 }
 0x252   :  { %2762 = vmatpush2.bf16.msra.mxu0 %v4191_v55  ;;  %v5071_v55 = vsub.s32 1, %v5069_v63 }
 0x253   :  { %2801 = vmatpush2.bf16.msra.mxu1 %v4188_v56  ;;  %2813 = vmatprep.subr.bf16.mxu0 %v4199_v1  ;;  %v1018_v56 = vrot.slane %v4970_v48, %v5070_v0  ;;  %v4246_v1 = vld [vmem:[#allocation6 + $0x790] ss:$24 sps:$4 sm:$0xff]  }
 0x254   :  { %2802 = vmatprep.subr.bf16.mxu1 %v4196_v24  ;;  %v1022_v24 = vrot.slane %v4970_v48, %v5071_v55  ;;  %v4283_v0 = vld [vmem:[#allocation9 + $0x160] sm:$0xff]   ;;  %v4285_v55 = vld [vmem:[#allocation9 + $0x158] sm:$0xff]  }
 0x255   :  { %v4959_v36 = vpop.f32.mrf.mxu0  ;;  %2764 = vmatmul.mubr.bf16.vlgmr.msra.gmra.mxu0 %v4903_v38 }
 0x256   :  { %2814 = vmatpush1.bf16.msra.mxu0 %v4197_v33  ;;  %2845 = vmatprep.mubr.bf16.mxu0 %v4940_v39  ;;  %v4249_v39 = vld [vmem:[#allocation9 + $0x68] sm:$0xff]  }
 0x257   :  { %2803 = vmatpush2.bf16.msra.mxu1 %v4194_v11  ;;  %v4963_v10 = vpop.f32.mrf.mxu0  ;;  %2815 = vmatprep.subr.bf16.mxu0 %v4202_v60  ;;  %v2520_v11 = vadd.f32 %v4959_v36, %v1018_v56  ;;  %v4284_v56 = vld [vmem:[#allocation9 + $0x120] sm:$0xff]  }
 0x258   :  { %3733 = vmatprep.subr.bf16.mxu1 %v4239_v9  ;;  %v2522_v33 = vadd.f32 %v4963_v10, %v1022_v24  ;;  %v4277_v10 = vld [vmem:[#allocation9 + $0x178] sm:$0xff]  }
 0x259   :  { %v2523_v62 = vpop.f32.mrf.mxu0  ;;  %v4286_v24 = vld [vmem:[#allocation9 + $0x118] sm:$0xff]  }
 0x25a   :  { %2805 = vmatmul.mubr.bf16.vlgmr.msra.gmra.mxu1 %v4925_v52  ;;  %v4966_v50 = vpop.f32.mrf.mxu1  ;;  %2816 = vmatpush1.bf16.msra.mxu0 %v4200_v41  ;;  %v4206_v52 = vld [vmem:[#allocation6 + $0x6d0] ss:$24 sps:$4 sm:$0xff]  }
 0x25b   :  { %3734 = vmatpush3.bf16.msra.mxu1 %v4240_v2  ;;  %v2524_v38 = vpop.f32.mrf.mxu0  ;;  %2817 = vmatprep.subr.bf16.mxu0 %v4205_v26  ;;  %v2561_v60 = vadd.f32 %v4966_v50, %v2520_v11  ;;  %v4280_v50 = vld [vmem:[#allocation9 + $0x130] sm:$0xff]  }
 0x25c   :  { %v4968_v21 = vpop.f32.mrf.mxu1  ;;  %3735 = vmatprep.subr.bf16.mxu1 %v4244_v37 }
 0x25d   :  { %v2563_v2 = vadd.f32 %v4968_v21, %v2522_v33  ;;  %v4282_v21 = vld [vmem:[#allocation9 + $0x128] sm:$0xff]  }
 0x25e   :  { %v2564_v51 = vpop.f32.mrf.mxu1  ;;  %2818 = vmatpush1.bf16.msra.mxu0 %v4203_v14 }
 0x25f   :  { %3736 = vmatpush3.bf16.msra.mxu1 %v4245_v3  ;;  %2819 = vmatprep.subr.bf16.mxu0 %v4208_v46  ;;  %v4278_v46 = vld [vmem:[#allocation9 + $0x138] sm:$0xff]   ;;  %v4279_v51 = vld [vmem:[#allocation9 + $0x170] sm:$0xff]  }
 0x260   :  { %v2565_v6 = vpop.f32.mrf.mxu1  ;;  %3737 = vmatprep.subr.bf16.mxu1 %v4249_v39 }
 0x262   :  { %2820 = vmatpush1.bf16.msra.mxu0 %v4206_v52 }
 0x263   :  { %3738 = vmatpush3.bf16.msra.mxu1 %v4250_v47  ;;  %2821 = vmatprep.subr.bf16.mxu0 %v4211_v45 }
 0x264   :  { %3739 = vmatprep.subr.bf16.mxu1 %v4251_v5  ;;  %v4262_v5 = vld [vmem:[#allocation9 + $0xb8] sm:$0xff]  }
 0x266   :  { %2822 = vmatpush1.bf16.msra.mxu0 %v4209_v19  ;;  %v4264_v19 = vld [vmem:[#allocation9 + $0xb0] sm:$0xff]  }
 0x267   :  { %3740 = vmatpush3.bf16.msra.mxu1 %v4252_v59  ;;  %2823 = vmatprep.subr.bf16.mxu0 %v4214_v29  ;;  %v4263_v59 = vld [vmem:[#allocation9 + $0xf0] sm:$0xff]   ;;  %v4266_v29 = vld [vmem:[#allocation9 + $0xa8] sm:$0xff]  }
 0x268   :  { %3741 = vmatprep.subr.bf16.mxu1 %v4253_v42  ;;  %v4265_v42 = vld [vmem:[#allocation9 + $0xe8] sm:$0xff]  }
 0x26a   :  { %2824 = vmatpush1.bf16.msra.mxu0 %v4212_v57  ;;  %v4268_v57 = vld [vmem:[#allocation9 + $0xa0] sm:$0xff]  }
 0x26b   :  { %3742 = vmatpush3.bf16.msra.mxu1 %v4254_v4  ;;  %2825 = vmatprep.subr.bf16.mxu0 %v4217_v53  ;;  %v4267_v4 = vld [vmem:[#allocation9 + $0xe0] sm:$0xff]   ;;  %v4270_v53 = vld [vmem:[#allocation9 + $0x98] sm:$0xff]  }
 0x26c   :  { %3743 = vmatprep.subr.bf16.mxu1 %v4255_v58  ;;  %v4269_v58 = vld [vmem:[#allocation9 + $0xd8] sm:$0xff]  }
 0x26e   :  { %2826 = vmatpush1.bf16.msra.mxu0 %v4215_v43  ;;  %v4272_v43 = vld [vmem:[#allocation9 + $0x90] sm:$0xff]  }
 0x26f   :  { %3744 = vmatpush3.bf16.msra.mxu1 %v4256_v27  ;;  %2827 = vmatprep.subr.bf16.mxu0 %v4220_v30  ;;  %v4271_v27 = vld [vmem:[#allocation9 + $0xd0] sm:$0xff]   ;;  %v4274_v30 = vld [vmem:[#allocation9 + $0x88] sm:$0xff]  }
 0x270   :  { %3745 = vmatprep.subr.bf16.mxu1 %v4257_v28  ;;  %v4273_v28 = vld [vmem:[#allocation9 + $0xc8] sm:$0xff]  }
 0x272   :  { %2828 = vmatpush1.bf16.msra.mxu0 %v4218_v32  ;;  %v4276_v32 = vld [vmem:[#allocation9 + $0x80] sm:$0xff]  }
 0x273   :  { %3746 = vmatpush3.bf16.msra.mxu1 %v4258_v25  ;;  %2829 = vmatprep.subr.bf16.mxu0 %v4223_v15  ;;  %v4275_v25 = vld [vmem:[#allocation9 + $0xc0] sm:$0xff]  }
 0x274   :  { %3747 = vmatprep.subr.bf16.mxu1 %v4259_v22  ;;  %v5072_v22 = vsub.s32 2, %v5069_v63 }
 0x276   :  { %2830 = vmatpush2.bf16.msra.mxu0 %v4221_v12  ;;  %v1026_v15 = vrot.slane %v4970_v48, %v5072_v22 }
 0x277   :  { %3748 = vmatpush3.bf16.msra.mxu1 %v4260_v54  ;;  %2831 = vmatprep.subr.bf16.mxu0 %v4226_v44  ;;  %v5073_v54 = vsub.s32 3, %v5069_v63 }
 0x278   :  { %3755 = vmatprep.subr.bf16.mxu1 %v4261_v8 }
 0x279   :  { %v1030_v12 = vrot.slane %v4970_v48, %v5073_v54 }
 0x27a   :  { %2832 = vmatpush2.bf16.msra.mxu0 %v4224_v17 }
 0x27b   :  { %2833 = vmatprep.subr.bf16.mxu0 %v4229_v49 }
 0x27e   :  { %2834 = vmatpush2.bf16.msra.mxu0 %v4227_v61 }
 0x27f   :  { %2835 = vmatprep.subr.bf16.mxu0 %v4232_v20 }
 0x282   :  { %2836 = vmatpush2.bf16.msra.mxu0 %v4230_v31 }
 0x283   :  { %2837 = vmatprep.subr.bf16.mxu0 %v4235_v34 }
 0x286   :  { %2838 = vmatpush2.bf16.msra.mxu0 %v4233_v18 }
 0x287   :  { %2839 = vmatprep.subr.bf16.mxu0 %v4238_v7 }
 0x28a   :  { %2840 = vmatpush2.bf16.msra.mxu0 %v4236_v13 }
 0x28b   :  { %2841 = vmatprep.subr.bf16.mxu0 %v4243_v23 }
 0x28e   :  { %2842 = vmatpush2.bf16.msra.mxu0 %v4241_v16 }
 0x28f   :  { %2843 = vmatprep.subr.bf16.mxu0 %v4248_v40 }
 0x292   :  { %2844 = vmatpush2.bf16.msra.mxu0 %v4246_v1  ;;  %v4287_v1 = vld [vmem:[#allocation9 + $0x150] sm:$0xff]  }
 0x293   :  { %3777 = vmatprep.subr.bf16.mxu0 %v4277_v10 }
 0x295   :  { %v2601_v9 = vpop.f32.mrf.mxu0  ;;  %2846 = vmatmul.mubr.bf16.vlgmr.msra.gmra.mxu0 %v4949_v35  ;;  %v4281_v35 = vld [vmem:[#allocation9 + $0x168] sm:$0xff]  }
 0x296   :  { %v2602_v41 = vadd.f32 %v2601_v9, %v2561_v60  ;;  %3778 = vmatpush3.bf16.msra.mxu0 %v4278_v46  ;;  %v4288_v60 = vld [vmem:[#allocation9 + $0x110] sm:$0xff]  }
 0x297   :  { %v2603_v37 = vpop.f32.mrf.mxu0  ;;  %3779 = vmatprep.subr.bf16.mxu0 %v4279_v51 }
 0x298   :  { %v2604_v62 = vadd.f32 %v2603_v37, %v2563_v2  ;;  %4295 = vtanh.f32 %v2602_v41  ;;  %v4289_v2 = vld [vmem:[#allocation9 + $0x148] sm:$0xff]  }
 0x299   :  { %v2605_v3 = vpop.f32.mrf.mxu0  ;;  %v4290_v37 = vld [vmem:[#allocation9 + $0x108] sm:$0xff]  }
 0x29a   :  { %v2642_v26 = vpop.f32.mrf.mxu1  ;;  %4297 = vtanh.f32 %v2604_v62  ;;  %3780 = vmatpush3.bf16.msra.mxu0 %v4280_v50  ;;  %v4292_v62 = vld [vmem:[#allocation9 + $0x100] sm:$0xff]   ;;  %v5074_v50 = vsub.s32 4, %v5069_v63 }
 0x29b   :  { %v2606_v14 = vpop.f32.mrf.mxu0  ;;  %3781 = vmatprep.subr.bf16.mxu0 %v4281_v35  ;;  %v2643_v8 = vadd.f32 %v2642_v26, %v1026_v15  ;;  %v4291_v26 = vld [vmem:[#allocation9 + $0x140] sm:$0xff]  }
 0x29c   :  { %v2644_v38 = vpop.f32.mrf.mxu1  ;;  %v1034_v35 = vrot.slane %v4970_v48, %v5074_v50 }
 0x29d   :  { %v2645_v17 = vadd.f32 %v2644_v38, %v1030_v12 }
 0x29e   :  { %v2646_v36 = vpop.f32.mrf.mxu1  ;;  %3782 = vmatpush3.bf16.msra.mxu0 %v4282_v21  ;;  %v5075_v21 = vsub.s32 5, %v5069_v63 }
 0x29f   :  { %3783 = vmatprep.subr.bf16.mxu0 %v4283_v0 }
 0x2a0   :  { %v2647_v39 = vpop.f32.mrf.mxu1 }
 0x2a2   :  { %3784 = vmatpush3.bf16.msra.mxu0 %v4284_v56 }
 0x2a3   :  { %3785 = vmatprep.subr.bf16.mxu0 %v4285_v55 }
 0x2a5   :  { %v4296_v47 = vpop.eup %4295 }
 0x2a6   :  { %v2860_v45 = vpack.c.bf16 %v4296_v47, %v4296_v47  ;;  %3786 = vmatpush3.bf16.msra.mxu0 %v4286_v24  ;;  %v1038_v47 = vrot.slane %v4970_v48, %v5075_v21 }
 0x2a7   :  { %v4298_v6 = vpop.eup %4297  ;;  %3787 = vmatprep.subr.bf16.mxu0 %v4287_v1 }
 0x2a8   :  { %v2861_v52 = vpack.c.bf16 %v4298_v6, %v4298_v6 }
 0x2aa   :  { %3289 = vmatprep.mubr.bf16.mxu1 %v2861_v52  ;;  %3788 = vmatpush3.bf16.msra.mxu0 %v4288_v60 }
 0x2ab   :  { %3290 = vmatmul.mubr.bf16.vlgmr.msra.gmra.mxu1 %v2860_v45  ;;  %3789 = vmatprep.subr.bf16.mxu0 %v4289_v2 }
 0x2ac   :  { %3756 = vmatpush3.bf16.msra.mxu1 %v4262_v5 }
 0x2ad   :  { %3757 = vmatprep.subr.bf16.mxu1 %v4263_v59 }
 0x2ae   :  { %3790 = vmatpush3.bf16.msra.mxu0 %v4290_v37 }
 0x2af   :  { %3791 = vmatprep.subr.bf16.mxu0 %v4291_v26 }
 0x2b0   :  { %3758 = vmatpush3.bf16.msra.mxu1 %v4264_v19 }
 0x2b1   :  { %3759 = vmatprep.subr.bf16.mxu1 %v4265_v42 }
 0x2b2   :  { %3792 = vmatpush3.bf16.msra.mxu0 %v4292_v62 }
 0x2b4   :  { %3760 = vmatpush3.bf16.msra.mxu1 %v4266_v29 }
 0x2b5   :  { %3761 = vmatprep.subr.bf16.mxu1 %v4267_v4 }
 0x2b8   :  { %3762 = vmatpush3.bf16.msra.mxu1 %v4268_v57 }
 0x2b9   :  { %3763 = vmatprep.subr.bf16.mxu1 %v4269_v58 }
 0x2bc   :  { %3764 = vmatpush3.bf16.msra.mxu1 %v4270_v53 }
 0x2bd   :  { %3765 = vmatprep.subr.bf16.mxu1 %v4271_v27 }
 0x2c0   :  { %3766 = vmatpush3.bf16.msra.mxu1 %v4272_v43 }
 0x2c1   :  { %3767 = vmatprep.subr.bf16.mxu1 %v4273_v28 }
 0x2c4   :  { %3768 = vmatpush3.bf16.msra.mxu1 %v4274_v30 }
 0x2c5   :  { %3769 = vmatprep.subr.bf16.mxu1 %v4275_v25 }
 0x2c8   :  { %3770 = vmatpush3.bf16.msra.mxu1 %v4276_v32  ;;  %v3684_v32 = vld [vmem:[#allocation11] ss:$0 sm:$0xff] }
 0x2d5   :  { %v2683_v44 = vpop.f32.mrf.mxu0 }
 0x2d6   :  { %v2684_v49 = vadd.f32 %v2683_v44, %v2643_v8 }
 0x2d7   :  { %v2685_v61 = vpop.f32.mrf.mxu0 }
 0x2d8   :  { %v2686_v31 = vadd.f32 %v2685_v61, %v2645_v17 }
 0x2d9   :  { %v2687_v18 = vpop.f32.mrf.mxu0 }
 0x2da   :  { %v2724_v20 = vpop.f32.mrf.mxu1 }
 0x2db   :  { %v2725_v34 = vadd.f32 %v2724_v20, %v2684_v49  ;;  %v2688_v23 = vpop.f32.mrf.mxu0 }
 0x2dc   :  { %v2726_v7 = vpop.f32.mrf.mxu1 }
 0x2dd   :  { %v2727_v13 = vadd.f32 %v2726_v7, %v2686_v31  ;;  %4299 = vtanh.f32 %v2725_v34 }
 0x2de   :  { %v2728_v16 = vpop.f32.mrf.mxu1 }
 0x2df   :  { %4301 = vtanh.f32 %v2727_v13 }
 0x2e0   :  { %v2729_v40 = vpop.f32.mrf.mxu1 }
 0x2ea   :  { %v4300_v11 = vpop.eup %4299 }
 0x2eb   :  { %v2862_v41 = vpack.c.bf16 %v4300_v11, %v4300_v11 }
 0x2ec   :  { %v4302_v33 = vpop.eup %4301 }
 0x2ed   :  { %v2863_v9 = vpack.c.bf16 %v4302_v33, %v4302_v33 }
 0x2ef   :  { %3329 = vmatprep.mubr.bf16.mxu1 %v2863_v9 }
 0x2f0   :  { %3330 = vmatmul.mubr.bf16.vlgmr.msra.gmra.mxu1 %v2862_v41 }
 0x315   :  { %v2765_v3 = vpop.f32.mrf.mxu0 }
 0x316   :  { %v2766_v6 = vadd.f32 %v2765_v3, %v1034_v35 }
 0x317   :  { %v2767_v38 = vpop.f32.mrf.mxu0 }
 0x318   :  { %v2768_v52 = vadd.f32 %v2767_v38, %v1038_v47 }
 0x319   :  { %v2769_v36 = vpop.f32.mrf.mxu0 }
 0x31a   :  { %v2806_v14 = vpop.f32.mrf.mxu1 }
 0x31b   :  { %v2770_v10 = vpop.f32.mrf.mxu0  ;;  %v2807_v5 = vadd.f32 %v2806_v14, %v2766_v6 }
 0x31c   :  { %v2808_v39 = vpop.f32.mrf.mxu1 }
 0x31d   :  { %v2809_v59 = vadd.f32 %v2808_v39, %v2768_v52 }
 0x31e   :  { %v2810_v46 = vpop.f32.mrf.mxu1 }
 0x320   :  { %v2811_v51 = vpop.f32.mrf.mxu1 }
 0x355   :  { %v2847_v45 = vpop.f32.mrf.mxu0 }
 0x356   :  { %v2848_v19 = vadd.f32 %v2847_v45, %v2807_v5 }
 0x357   :  { %v2849_v42 = vpop.f32.mrf.mxu0 }
 0x358   :  { %v2850_v29 = vadd.f32 %v2849_v42, %v2809_v59  ;;  %4303 = vtanh.f32 %v2848_v19 }
 0x359   :  { %v2851_v4 = vpop.f32.mrf.mxu0 }
 0x35a   :  { %4305 = vtanh.f32 %v2850_v29 }
 0x35b   :  { %v2852_v57 = vpop.f32.mrf.mxu0 }
 0x365   :  { %v4304_v58 = vpop.eup %4303 }
 0x366   :  { %v2864_v43 = vpack.c.bf16 %v4304_v58, %v4304_v58 }
 0x367   :  { %v4306_v53 = vpop.eup %4305 }
 0x368   :  { %v2865_v27 = vpack.c.bf16 %v4306_v53, %v4306_v53 }
 0x36a   :  { %3369 = vmatprep.mubr.bf16.mxu0 %v2865_v27 }
 0x36b   :  { %v3749_v63 = vpop.f32.mrf.mxu1  ;;  %3370 = vmatmul.mubr.bf16.vlgmr.msra.gmra.mxu0 %v2864_v43 }
 0x36d   :  { %v3750_v48 = vpop.f32.mrf.mxu1 }
 0x36e   :  { %v3751_v28 = vadd.f32 %v3750_v48, %v3749_v63 }
 0x36f   :  { %v3752_v30 = vpop.f32.mrf.mxu1 }
 0x370   :  { %v3292_v54 = vadd.f32 %v3751_v28, %v3684_v32 }
 0x371   :  { %v3753_v25 = vpop.f32.mrf.mxu1 }
 0x3b0   :  { %v3771_v22 = vpop.f32.mrf.mxu1 }
 0x3b2   :  { %v3772_v15 = vpop.f32.mrf.mxu1 }
 0x3b3   :  { %v3773_v12 = vadd.f32 %v3772_v15, %v3771_v22 }
 0x3b4   :  { %v3774_v8 = vpop.f32.mrf.mxu1 }
 0x3b5   :  { %v3332_v44 = vadd.f32 %v3773_v12, %v3292_v54 }
 0x3b6   :  { %v3775_v17 = vpop.f32.mrf.mxu1 }
 0x42b   :  { %v3793_v49 = vpop.f32.mrf.mxu0 }
 0x42d   :  { %v3794_v61 = vpop.f32.mrf.mxu0 }
 0x42e   :  { %v3795_v20 = vadd.f32 %v3794_v61, %v3793_v49 }
 0x42f   :  { %v3796_v31 = vpop.f32.mrf.mxu0 }
 0x430   :  { %v3372_v34 = vadd.f32 %v3795_v20, %v3332_v44 }
 0x431   :  { %v3797_v18 = vpop.f32.mrf.mxu0 }
 0x432   :  { %3377 = vst [vmem:[#allocation12] sm:$0xff] %v3372_v34 }
 0x433   :  { %4418 = shalt.err (!%p4415_p1)
}
 0x434   :  { %3387 = dma.vmem_to_hbm [thread:$0]  %s3385_s5, 128, %s5004_s6, [#allocation5]  }
 0x435   :  { %4433 = dma.done.wait [#allocation5], 128  }
 0x436   :  { %4434 = vsyncadd [#allocation5], 4294967168 }
 0x437   :  { %3391 = vsyncpa [#allocation4], 1 }
 0x438   :  { %3392 = vsyncpa [#allocation7], 1 }
 0x439   :  { %3393 = vsyncpa [#allocation10], 1 }
 0x43a   :  { %3394 = vsyncpa [#allocation5], 1 }

</bundles_post_ra>
